<compile_context>
chip_gen: v6e
topology: v6e:2x2x1
jax: 0.10.0
libtpu: 0.0.40
codegen_flags: <defaults>
</compile_context>

<pallas_src>
import functools

import jax
import jax.numpy as jnp
from jax.experimental import pallas as pl
from jax.experimental.pallas import tpu as pltpu


# ----------------------------- config (small) -----------------------------
CFG = dict(
    vocab_size=100,
    max_position=16,
    type_vocab_size=2,
    hidden=32,
    num_heads=4,
    head_dim=8,          # hidden // num_heads
    intermediate=64,
    num_layers=2,
    num_labels=2,
    layer_norm_eps=1e-12,
)

LABEL_PAD = 128   # lane-dense logits slab; real labels live in [:, :num_labels]
OUT_ROWS = 8      # sublane-dense output rows; rows [0, B) hold the real logits


# ------------------------------ fused kernel -------------------------------
def _fused_forward_kernel(
    x_ref,                     # (B*S, H)   f32 embedding sum (batch flattened)
    eg_ref, eb_ref,            # (1, H)     embedding layernorm gamma / beta
    wqkv_ref, bqkv_ref,        # (L, H, 3H) bf16 / (L, 1, 3H) f32 (q-scale folded)
    wo_ref, bo_ref,            # (L, H, H)  bf16 / (L, 1, H)  f32
    ln1g_ref, ln1b_ref,        # (L, 1, H)  f32
    w1_ref, b1_ref,            # (L, H, I)  bf16 / (L, 1, I)  f32
    w2_ref, b2_ref,            # (L, I, H)  bf16 / (L, 1, H)  f32
    ln2g_ref, ln2b_ref,        # (L, 1, H)  f32
    pw_ref, pb_ref,            # (H, H) bf16 / (1, H) f32
    cw_ref, cb_ref,            # (H, LABEL_PAD) bf16 / (1, LABEL_PAD) f32
    o_ref,                     # (OUT_ROWS, LABEL_PAD) f32
    *, batch, seq, num_layers, num_heads, head_dim, eps,
):
    M, H = x_ref.shape          # M = B*S

    def layernorm(v, g, b):
        mu = jnp.mean(v, axis=-1, keepdims=True)
        vc = v - mu
        var = jnp.mean(vc * vc, axis=-1, keepdims=True)
        return vc * jax.lax.rsqrt(var + eps) * g + b

    def matmul(a, w_bf16):
        # bf16 MXU operands, f32 accumulation.
        return jax.lax.dot_general(
            a.astype(jnp.bfloat16), w_bf16,
            (((1,), (0,)), ((), ())),
            preferred_element_type=jnp.float32)

    def erf_poly(z):
        # Abramowitz & Stegun 7.1.26 (max abs err ~1.5e-7): exact-GELU
        # semantics without relying on a native erf lowering in Mosaic.
        a1, a2, a3, a4, a5 = (0.254829592, -0.284496736, 1.421413741,
                              -1.453152027, 1.061405429)
        p = 0.3275911
        sgn = jnp.where(z >= 0.0, 1.0, -1.0)
        az = jnp.abs(z)
        t = 1.0 / (1.0 + p * az)
        poly = ((((a5 * t + a4) * t + a3) * t + a2) * t + a1) * t
        return sgn * (1.0 - poly * jnp.exp(-az * az))

    # Embedding layernorm over the whole flattened (B*S, H) slab.
    x = layernorm(x_ref[...].astype(jnp.float32), eg_ref[...], eb_ref[...])

    for l in range(num_layers):
        # ---- self attention: fused QKV projection over all B*S rows
        # (attention scale is folded into wq/bq at parameter-build time).
        qkv = matmul(x, wqkv_ref[l]) + bqkv_ref[l]          # (M, 3H), vregs

        # Per-(batch, head) attention on static slices of the QKV VALUE.
        # With only input_ids given, HF BERT's attention mask is all-ones ->
        # the additive extended mask is zero, so no masking term is needed.
        ctx_rows = []
        for b in range(batch):
            r0 = b * seq
            q_b = qkv[r0:r0 + seq, 0:H]
            k_b = qkv[r0:r0 + seq, H:2 * H]
            v_b = qkv[r0:r0 + seq, 2 * H:3 * H]
            head_ctx = []
            for h in range(num_heads):
                lo = h * head_dim
                q_h = q_b[:, lo:lo + head_dim]               # (S, dh)
                k_h = k_b[:, lo:lo + head_dim]
                v_h = v_b[:, lo:lo + head_dim]
                # "qd,kd->qk": rhs-contracting dim 1 (transpose folded by MXU)
                s = jax.lax.dot_general(
                    q_h, k_h, (((1,), (1,)), ((), ())),
                    preferred_element_type=jnp.float32)      # (S, S)
                m = jnp.max(s, axis=-1, keepdims=True)
                p = jnp.exp(s - m)
                p = p * pl.reciprocal(jnp.sum(p, axis=-1, keepdims=True),
                                      approx=True)
                head_ctx.append(jax.lax.dot_general(
                    p, v_h, (((1,), (0,)), ((), ())),
                    preferred_element_type=jnp.float32))     # (S, dh)
            ctx_rows.append(jnp.concatenate(head_ctx, axis=-1))   # (S, H)
        ctx = jnp.concatenate(ctx_rows, axis=0)                    # (M, H)

        attn_out = matmul(ctx, wo_ref[l]) + bo_ref[l]
        x = layernorm(x + attn_out, ln1g_ref[l], ln1b_ref[l])

        # ---- feed forward (exact erf-based GELU, matches HF "gelu").
        hmid = matmul(x, w1_ref[l]) + b1_ref[l]
        hmid = 0.5 * hmid * (1.0 + erf_poly(hmid * jnp.float32(0.7071067811865476)))
        ff = matmul(hmid, w2_ref[l]) + b2_ref[l]
        x = layernorm(x + ff, ln2g_ref[l], ln2b_ref[l])

    # ---- pooler (tanh) on CLS tokens + classifier (dropout: eval no-op).
    # Pad the CLS matrix to OUT_ROWS so the output is one unmasked dense
    # (OUT_ROWS, LABEL_PAD) store; padding rows are duplicates and discarded.
    cls_rows = [x[b * seq:b * seq + 1, :] for b in range(batch)]
    cls_rows += [cls_rows[0]] * (o_ref.shape[0] - batch)
    cls = jnp.concatenate(cls_rows, axis=0)                        # (8, H)
    pooled = jnp.tanh(matmul(cls, pw_ref[...]) + pb_ref[...])
    logits = matmul(pooled, cw_ref[...]) + cb_ref[...]             # (8, 128)
    o_ref[...] = logits.astype(o_ref.dtype)


# ----------------------------- parameter init ------------------------------
def init_params(key):
    H, I, L = CFG["hidden"], CFG["intermediate"], CFG["num_layers"]
    dh = CFG["head_dim"]
    keys = iter(jax.random.split(key, 64))

    def w(shape, std=0.02):
        return jax.random.normal(next(keys), shape, jnp.float32) * std

    def zeros(shape):
        return jnp.zeros(shape, jnp.float32)

    def ones(shape):
        return jnp.ones(shape, jnp.float32)

    def bf(t):
        return t.astype(jnp.bfloat16)

    word_emb = w((CFG["vocab_size"], H))
    pos_emb = w((CFG["max_position"], H))
    type_emb = w((CFG["type_vocab_size"], H))

    scale = 1.0 / (dh ** 0.5)
    wq, wk, wv = w((L, H, H)), w((L, H, H)), w((L, H, H))
    bq, bk, bv = zeros((L, 1, H)), zeros((L, 1, H)), zeros((L, 1, H))
    # Fold the 1/sqrt(head_dim) attention scale into the query projection.
    wqkv = jnp.concatenate([wq * scale, wk, wv], axis=-1)     # (L, H, 3H)
    bqkv = jnp.concatenate([bq * scale, bk, bv], axis=-1)     # (L, 1, 3H)

    pooler_w = w((H, H))
    cls_w = w((H, CFG["num_labels"]))
    cls_b = zeros((1, CFG["num_labels"]))
    # Lane-dense padded classifier (real labels in the first num_labels lanes).
    cls_w_pad = jnp.zeros((H, LABEL_PAD), jnp.float32)
    cls_w_pad = cls_w_pad.at[:, :CFG["num_labels"]].set(cls_w)
    cls_b_pad = jnp.zeros((1, LABEL_PAD), jnp.float32)
    cls_b_pad = cls_b_pad.at[:, :CFG["num_labels"]].set(cls_b)

    return dict(
        word_emb=word_emb, pos_emb=pos_emb, type_emb=type_emb,
        emb_ln_g=ones((1, H)), emb_ln_b=zeros((1, H)),
        wqkv=bf(wqkv), bqkv=bqkv,
        wo=bf(w((L, H, H))), bo=zeros((L, 1, H)),
        ln1_g=ones((L, 1, H)), ln1_b=zeros((L, 1, H)),
        w1=bf(w((L, H, I))), b1=zeros((L, 1, I)),
        w2=bf(w((L, I, H))), b2=zeros((L, 1, H)),
        ln2_g=ones((L, 1, H)), ln2_b=zeros((L, 1, H)),
        pooler_w=bf(pooler_w), pooler_b=zeros((1, H)),
        cls_w=bf(cls_w_pad), cls_b=cls_b_pad,
    )


# ------------------------------ model forward ------------------------------
# TODO(synk): cannot load the real pretrained HF checkpoint here (no file /
# network access); weights are deterministic random with identical structure.
def minilm_forward(params, tokens):
    B, S = tokens.shape
    H, I, L = CFG["hidden"], CFG["intermediate"], CFG["num_layers"]
    nH, dh = CFG["num_heads"], CFG["head_dim"]
    assert B <= OUT_ROWS

    # Embedding gathers + sums are glue (plain JAX); token_type_ids == 0.
    word = jnp.take(params["word_emb"], tokens, axis=0)        # (B, S, H)
    pos = params["pos_emb"][:S][None, :, :]                    # (1, S, H)
    tok = params["type_emb"][0][None, None, :]                 # (1, 1, H)
    x_emb = (word + pos + tok).reshape(B * S, H)               # (B*S, H) f32

    weight_names = ["emb_ln_g", "emb_ln_b", "wqkv", "bqkv", "wo", "bo",
                    "ln1_g", "ln1_b", "w1", "b1", "w2", "b2",
                    "ln2_g", "ln2_b", "pooler_w", "pooler_b", "cls_w", "cls_b"]
    weights = [params[n] for n in weight_names]

    kernel = functools.partial(
        _fused_forward_kernel,
        batch=B, seq=S, num_layers=L, num_heads=nH, head_dim=dh,
        eps=CFG["layer_norm_eps"])

    # Advisory cost hint for XLA scheduling around the custom call.
    M = B * S
    flops = (L * (2 * M * H * 3 * H          # qkv
                  + B * nH * 4 * S * S * dh  # scores + context
                  + 2 * M * H * H            # attn output proj
                  + 4 * M * H * I)           # ffn
             + 2 * OUT_ROWS * H * H + 2 * OUT_ROWS * H * LABEL_PAD)
    transcendentals = L * (B * nH * S * S + M * I) + OUT_ROWS * H
    bytes_accessed = (x_emb.size * 4 + sum(int(a.nbytes) for a in weights)
                      + OUT_ROWS * LABEL_PAD * 4)

    # Single gridless pallas_call: whole forward fused, all operands in VMEM.
    out = pl.pallas_call(
        kernel,
        out_shape=jax.ShapeDtypeStruct((OUT_ROWS, LABEL_PAD), jnp.float32),
        in_specs=[pl.BlockSpec(memory_space=pltpu.MemorySpace.VMEM)]
                 * (1 + len(weights)),
        out_specs=pl.BlockSpec(memory_space=pltpu.MemorySpace.VMEM),
        cost_estimate=pl.CostEstimate(
            flops=flops, transcendentals=transcendentals,
            bytes_accessed=bytes_accessed),
    )(x_emb, *weights)

    return out[:B, :CFG["num_labels"]]                          # (B, num_labels)


# ---------------------------------- main -----------------------------------
if __name__ == "__main__":
    key = jax.random.PRNGKey(0)
    pkey, tkey = jax.random.split(key)

    params = init_params(pkey)

    B, S = 2, 8
    tokens = jax.random.randint(tkey, (B, S), 0, CFG["vocab_size"], jnp.int32)

    logits = jax.jit(minilm_forward)(params, tokens)
    logits = jax.block_until_ready(logits)

    assert logits.shape == (B, CFG["num_labels"])
    assert logits.dtype == jnp.float32
    assert bool(jnp.all(jnp.isfinite(logits)))
    print("KERNEL_OK")
</pallas_src>

<mosaic_0001>
module attributes {stable_mosaic.version = 11 : i64} {
  func.func @_fused_forward_kernel(%arg0: memref<16x32xf32, #tpu.memory_space<vmem>>, %arg1: memref<1x32xf32, #tpu.memory_space<vmem>>, %arg2: memref<1x32xf32, #tpu.memory_space<vmem>>, %arg3: memref<2x32x96xbf16, #tpu.memory_space<vmem>>, %arg4: memref<2x1x96xf32, #tpu.memory_space<vmem>>, %arg5: memref<2x32x32xbf16, #tpu.memory_space<vmem>>, %arg6: memref<2x1x32xf32, #tpu.memory_space<vmem>>, %arg7: memref<2x1x32xf32, #tpu.memory_space<vmem>>, %arg8: memref<2x1x32xf32, #tpu.memory_space<vmem>>, %arg9: memref<2x32x64xbf16, #tpu.memory_space<vmem>>, %arg10: memref<2x1x64xf32, #tpu.memory_space<vmem>>, %arg11: memref<2x64x32xbf16, #tpu.memory_space<vmem>>, %arg12: memref<2x1x32xf32, #tpu.memory_space<vmem>>, %arg13: memref<2x1x32xf32, #tpu.memory_space<vmem>>, %arg14: memref<2x1x32xf32, #tpu.memory_space<vmem>>, %arg15: memref<32x32xbf16, #tpu.memory_space<vmem>>, %arg16: memref<1x32xf32, #tpu.memory_space<vmem>>, %arg17: memref<32x128xbf16, #tpu.memory_space<vmem>>, %arg18: memref<1x128xf32, #tpu.memory_space<vmem>>, %arg19: memref<8x128xf32, #tpu.memory_space<vmem>>) attributes {dimension_semantics = [], scalar_prefetch = 0 : i64, scratch_operands = 0 : i64, tpu.core_type = #tpu.core_type<tc>} {
    %c0 = arith.constant 0 : index
    %c0_0 = arith.constant 0 : index
    %0 = vector.load %arg0[%c0, %c0_0] : memref<16x32xf32, #tpu.memory_space<vmem>>, vector<16x32xf32>
    %c0_1 = arith.constant 0 : index
    %c0_2 = arith.constant 0 : index
    %1 = vector.load %arg1[%c0_1, %c0_2] : memref<1x32xf32, #tpu.memory_space<vmem>>, vector<1x32xf32>
    %c0_3 = arith.constant 0 : index
    %c0_4 = arith.constant 0 : index
    %2 = vector.load %arg2[%c0_3, %c0_4] : memref<1x32xf32, #tpu.memory_space<vmem>>, vector<1x32xf32>
    %cst = arith.constant dense<0.000000e+00> : vector<16xf32>
    %3 = vector.multi_reduction <add>, %0, %cst [1] : vector<16x32xf32> to vector<16xf32>
    %4 = vector.shape_cast %3 : vector<16xf32> to vector<16x1xf32>
    %cst_5 = arith.constant 3.200000e+01 : f32
    %5 = vector.broadcast %cst_5 : f32 to vector<16x1xf32>
    %6 = arith.divf %4, %5 : vector<16x1xf32>
    %7 = vector.broadcast %6 : vector<16x1xf32> to vector<16x32xf32>
    %8 = arith.subf %0, %7 : vector<16x32xf32>
    %9 = arith.mulf %8, %8 : vector<16x32xf32>
    %cst_6 = arith.constant dense<0.000000e+00> : vector<16xf32>
    %10 = vector.multi_reduction <add>, %9, %cst_6 [1] : vector<16x32xf32> to vector<16xf32>
    %11 = vector.shape_cast %10 : vector<16xf32> to vector<16x1xf32>
    %cst_7 = arith.constant 3.200000e+01 : f32
    %12 = vector.broadcast %cst_7 : f32 to vector<16x1xf32>
    %13 = arith.divf %11, %12 : vector<16x1xf32>
    %cst_8 = arith.constant 9.99999996E-13 : f32
    %14 = vector.broadcast %cst_8 : f32 to vector<16x1xf32>
    %15 = arith.addf %13, %14 : vector<16x1xf32>
    %16 = math.rsqrt %15 : vector<16x1xf32>
    %17 = vector.broadcast %16 : vector<16x1xf32> to vector<16x32xf32>
    %18 = arith.mulf %8, %17 : vector<16x32xf32>
    %19 = vector.broadcast %1 : vector<1x32xf32> to vector<16x32xf32>
    %20 = arith.mulf %18, %19 : vector<16x32xf32>
    %21 = vector.broadcast %2 : vector<1x32xf32> to vector<16x32xf32>
    %22 = arith.addf %20, %21 : vector<16x32xf32>
    %c0_9 = arith.constant 0 : index
    %c0_10 = arith.constant 0 : index
    %c0_11 = arith.constant 0 : index
    %23 = vector.load %arg3[%c0_9, %c0_10, %c0_11] : memref<2x32x96xbf16, #tpu.memory_space<vmem>>, vector<1x32x96xbf16>
    %24 = vector.shape_cast %23 : vector<1x32x96xbf16> to vector<32x96xbf16>
    %25 = arith.truncf %22 : vector<16x32xf32> to vector<16x32xbf16>
    %cst_12 = arith.constant dense<0.000000e+00> : vector<16x96xf32>
    %26 = tpu.matmul %25, %24, %cst_12 {dimension_numbers = #tpu.dot_dimension_numbers<[1], [0], [0], [1], [0, 0, 1, 1], [], []>} : vector<16x32xbf16>, vector<32x96xbf16>, vector<16x96xf32> -> vector<16x96xf32>
    %c0_13 = arith.constant 0 : index
    %c0_14 = arith.constant 0 : index
    %c0_15 = arith.constant 0 : index
    %27 = vector.load %arg4[%c0_13, %c0_14, %c0_15] : memref<2x1x96xf32, #tpu.memory_space<vmem>>, vector<1x1x96xf32>
    %28 = vector.shape_cast %27 : vector<1x1x96xf32> to vector<1x96xf32>
    %29 = vector.broadcast %28 : vector<1x96xf32> to vector<16x96xf32>
    %30 = arith.addf %26, %29 : vector<16x96xf32>
    %31 = vector.extract_strided_slice %30 {offsets = [0, 0], sizes = [8, 32], strides = [1, 1]} : vector<16x96xf32> to vector<8x32xf32>
    %32 = vector.extract_strided_slice %30 {offsets = [0, 32], sizes = [8, 32], strides = [1, 1]} : vector<16x96xf32> to vector<8x32xf32>
    %33 = vector.extract_strided_slice %30 {offsets = [0, 64], sizes = [8, 32], strides = [1, 1]} : vector<16x96xf32> to vector<8x32xf32>
    %34 = vector.extract_strided_slice %31 {offsets = [0, 0], sizes = [8, 8], strides = [1, 1]} : vector<8x32xf32> to vector<8x8xf32>
    %35 = vector.extract_strided_slice %32 {offsets = [0, 0], sizes = [8, 8], strides = [1, 1]} : vector<8x32xf32> to vector<8x8xf32>
    %36 = vector.extract_strided_slice %33 {offsets = [0, 0], sizes = [8, 8], strides = [1, 1]} : vector<8x32xf32> to vector<8x8xf32>
    %cst_16 = arith.constant dense<0.000000e+00> : vector<8x8xf32>
    %37 = tpu.matmul %34, %35, %cst_16 {dimension_numbers = #tpu.dot_dimension_numbers<[1], [1], [0], [0], [0, 0, 1, 0], [], []>} : vector<8x8xf32>, vector<8x8xf32>, vector<8x8xf32> -> vector<8x8xf32>
    %cst_17 = arith.constant dense<0xFF800000> : vector<8xf32>
    %38 = vector.multi_reduction <maximumf>, %37, %cst_17 [1] : vector<8x8xf32> to vector<8xf32>
    %39 = vector.shape_cast %38 : vector<8xf32> to vector<8x1xf32>
    %40 = vector.broadcast %39 : vector<8x1xf32> to vector<8x8xf32>
    %41 = arith.subf %37, %40 : vector<8x8xf32>
    %42 = math.exp %41 : vector<8x8xf32>
    %cst_18 = arith.constant dense<0.000000e+00> : vector<8xf32>
    %43 = vector.multi_reduction <add>, %42, %cst_18 [1] : vector<8x8xf32> to vector<8xf32>
    %44 = vector.shape_cast %43 : vector<8xf32> to vector<8x1xf32>
    %45 = tpu.reciprocal %44 {approx = true} : vector<8x1xf32> -> vector<8x1xf32>
    %46 = vector.broadcast %45 : vector<8x1xf32> to vector<8x8xf32>
    %47 = arith.mulf %42, %46 : vector<8x8xf32>
    %cst_19 = arith.constant dense<0.000000e+00> : vector<8x8xf32>
    %48 = tpu.matmul %47, %36, %cst_19 {dimension_numbers = #tpu.dot_dimension_numbers<[1], [0], [0], [1], [0, 0, 1, 1], [], []>} : vector<8x8xf32>, vector<8x8xf32>, vector<8x8xf32> -> vector<8x8xf32>
    %49 = vector.extract_strided_slice %31 {offsets = [0, 8], sizes = [8, 8], strides = [1, 1]} : vector<8x32xf32> to vector<8x8xf32>
    %50 = vector.extract_strided_slice %32 {offsets = [0, 8], sizes = [8, 8], strides = [1, 1]} : vector<8x32xf32> to vector<8x8xf32>
    %51 = vector.extract_strided_slice %33 {offsets = [0, 8], sizes = [8, 8], strides = [1, 1]} : vector<8x32xf32> to vector<8x8xf32>
    %cst_20 = arith.constant dense<0.000000e+00> : vector<8x8xf32>
    %52 = tpu.matmul %49, %50, %cst_20 {dimension_numbers = #tpu.dot_dimension_numbers<[1], [1], [0], [0], [0, 0, 1, 0], [], []>} : vector<8x8xf32>, vector<8x8xf32>, vector<8x8xf32> -> vector<8x8xf32>
    %cst_21 = arith.constant dense<0xFF800000> : vector<8xf32>
    %53 = vector.multi_reduction <maximumf>, %52, %cst_21 [1] : vector<8x8xf32> to vector<8xf32>
    %54 = vector.shape_cast %53 : vector<8xf32> to vector<8x1xf32>
    %55 = vector.broadcast %54 : vector<8x1xf32> to vector<8x8xf32>
    %56 = arith.subf %52, %55 : vector<8x8xf32>
    %57 = math.exp %56 : vector<8x8xf32>
    %cst_22 = arith.constant dense<0.000000e+00> : vector<8xf32>
    %58 = vector.multi_reduction <add>, %57, %cst_22 [1] : vector<8x8xf32> to vector<8xf32>
    %59 = vector.shape_cast %58 : vector<8xf32> to vector<8x1xf32>
    %60 = tpu.reciprocal %59 {approx = true} : vector<8x1xf32> -> vector<8x1xf32>
    %61 = vector.broadcast %60 : vector<8x1xf32> to vector<8x8xf32>
    %62 = arith.mulf %57, %61 : vector<8x8xf32>
    %cst_23 = arith.constant dense<0.000000e+00> : vector<8x8xf32>
    %63 = tpu.matmul %62, %51, %cst_23 {dimension_numbers = #tpu.dot_dimension_numbers<[1], [0], [0], [1], [0, 0, 1, 1], [], []>} : vector<8x8xf32>, vector<8x8xf32>, vector<8x8xf32> -> vector<8x8xf32>
    %64 = vector.extract_strided_slice %31 {offsets = [0, 16], sizes = [8, 8], strides = [1, 1]} : vector<8x32xf32> to vector<8x8xf32>
    %65 = vector.extract_strided_slice %32 {offsets = [0, 16], sizes = [8, 8], strides = [1, 1]} : vector<8x32xf32> to vector<8x8xf32>
    %66 = vector.extract_strided_slice %33 {offsets = [0, 16], sizes = [8, 8], strides = [1, 1]} : vector<8x32xf32> to vector<8x8xf32>
    %cst_24 = arith.constant dense<0.000000e+00> : vector<8x8xf32>
    %67 = tpu.matmul %64, %65, %cst_24 {dimension_numbers = #tpu.dot_dimension_numbers<[1], [1], [0], [0], [0, 0, 1, 0], [], []>} : vector<8x8xf32>, vector<8x8xf32>, vector<8x8xf32> -> vector<8x8xf32>
    %cst_25 = arith.constant dense<0xFF800000> : vector<8xf32>
    %68 = vector.multi_reduction <maximumf>, %67, %cst_25 [1] : vector<8x8xf32> to vector<8xf32>
    %69 = vector.shape_cast %68 : vector<8xf32> to vector<8x1xf32>
    %70 = vector.broadcast %69 : vector<8x1xf32> to vector<8x8xf32>
    %71 = arith.subf %67, %70 : vector<8x8xf32>
    %72 = math.exp %71 : vector<8x8xf32>
    %cst_26 = arith.constant dense<0.000000e+00> : vector<8xf32>
    %73 = vector.multi_reduction <add>, %72, %cst_26 [1] : vector<8x8xf32> to vector<8xf32>
    %74 = vector.shape_cast %73 : vector<8xf32> to vector<8x1xf32>
    %75 = tpu.reciprocal %74 {approx = true} : vector<8x1xf32> -> vector<8x1xf32>
    %76 = vector.broadcast %75 : vector<8x1xf32> to vector<8x8xf32>
    %77 = arith.mulf %72, %76 : vector<8x8xf32>
    %cst_27 = arith.constant dense<0.000000e+00> : vector<8x8xf32>
    %78 = tpu.matmul %77, %66, %cst_27 {dimension_numbers = #tpu.dot_dimension_numbers<[1], [0], [0], [1], [0, 0, 1, 1], [], []>} : vector<8x8xf32>, vector<8x8xf32>, vector<8x8xf32> -> vector<8x8xf32>
    %79 = vector.extract_strided_slice %31 {offsets = [0, 24], sizes = [8, 8], strides = [1, 1]} : vector<8x32xf32> to vector<8x8xf32>
    %80 = vector.extract_strided_slice %32 {offsets = [0, 24], sizes = [8, 8], strides = [1, 1]} : vector<8x32xf32> to vector<8x8xf32>
    %81 = vector.extract_strided_slice %33 {offsets = [0, 24], sizes = [8, 8], strides = [1, 1]} : vector<8x32xf32> to vector<8x8xf32>
    %cst_28 = arith.constant dense<0.000000e+00> : vector<8x8xf32>
    %82 = tpu.matmul %79, %80, %cst_28 {dimension_numbers = #tpu.dot_dimension_numbers<[1], [1], [0], [0], [0, 0, 1, 0], [], []>} : vector<8x8xf32>, vector<8x8xf32>, vector<8x8xf32> -> vector<8x8xf32>
    %cst_29 = arith.constant dense<0xFF800000> : vector<8xf32>
    %83 = vector.multi_reduction <maximumf>, %82, %cst_29 [1] : vector<8x8xf32> to vector<8xf32>
    %84 = vector.shape_cast %83 : vector<8xf32> to vector<8x1xf32>
    %85 = vector.broadcast %84 : vector<8x1xf32> to vector<8x8xf32>
    %86 = arith.subf %82, %85 : vector<8x8xf32>
    %87 = math.exp %86 : vector<8x8xf32>
    %cst_30 = arith.constant dense<0.000000e+00> : vector<8xf32>
    %88 = vector.multi_reduction <add>, %87, %cst_30 [1] : vector<8x8xf32> to vector<8xf32>
    %89 = vector.shape_cast %88 : vector<8xf32> to vector<8x1xf32>
    %90 = tpu.reciprocal %89 {approx = true} : vector<8x1xf32> -> vector<8x1xf32>
    %91 = vector.broadcast %90 : vector<8x1xf32> to vector<8x8xf32>
    %92 = arith.mulf %87, %91 : vector<8x8xf32>
    %cst_31 = arith.constant dense<0.000000e+00> : vector<8x8xf32>
    %93 = tpu.matmul %92, %81, %cst_31 {dimension_numbers = #tpu.dot_dimension_numbers<[1], [0], [0], [1], [0, 0, 1, 1], [], []>} : vector<8x8xf32>, vector<8x8xf32>, vector<8x8xf32> -> vector<8x8xf32>
    %94 = tpu.concatenate %48, %63, %78, %93 in 1 : vector<8x8xf32>, vector<8x8xf32>, vector<8x8xf32>, vector<8x8xf32> -> vector<8x32xf32>
    %95 = vector.extract_strided_slice %30 {offsets = [8, 0], sizes = [8, 32], strides = [1, 1]} : vector<16x96xf32> to vector<8x32xf32>
    %96 = vector.extract_strided_slice %30 {offsets = [8, 32], sizes = [8, 32], strides = [1, 1]} : vector<16x96xf32> to vector<8x32xf32>
    %97 = vector.extract_strided_slice %30 {offsets = [8, 64], sizes = [8, 32], strides = [1, 1]} : vector<16x96xf32> to vector<8x32xf32>
    %98 = vector.extract_strided_slice %95 {offsets = [0, 0], sizes = [8, 8], strides = [1, 1]} : vector<8x32xf32> to vector<8x8xf32>
    %99 = vector.extract_strided_slice %96 {offsets = [0, 0], sizes = [8, 8], strides = [1, 1]} : vector<8x32xf32> to vector<8x8xf32>
    %100 = vector.extract_strided_slice %97 {offsets = [0, 0], sizes = [8, 8], strides = [1, 1]} : vector<8x32xf32> to vector<8x8xf32>
    %cst_32 = arith.constant dense<0.000000e+00> : vector<8x8xf32>
    %101 = tpu.matmul %98, %99, %cst_32 {dimension_numbers = #tpu.dot_dimension_numbers<[1], [1], [0], [0], [0, 0, 1, 0], [], []>} : vector<8x8xf32>, vector<8x8xf32>, vector<8x8xf32> -> vector<8x8xf32>
    %cst_33 = arith.constant dense<0xFF800000> : vector<8xf32>
    %102 = vector.multi_reduction <maximumf>, %101, %cst_33 [1] : vector<8x8xf32> to vector<8xf32>
    %103 = vector.shape_cast %102 : vector<8xf32> to vector<8x1xf32>
    %104 = vector.broadcast %103 : vector<8x1xf32> to vector<8x8xf32>
    %105 = arith.subf %101, %104 : vector<8x8xf32>
    %106 = math.exp %105 : vector<8x8xf32>
    %cst_34 = arith.constant dense<0.000000e+00> : vector<8xf32>
    %107 = vector.multi_reduction <add>, %106, %cst_34 [1] : vector<8x8xf32> to vector<8xf32>
    %108 = vector.shape_cast %107 : vector<8xf32> to vector<8x1xf32>
    %109 = tpu.reciprocal %108 {approx = true} : vector<8x1xf32> -> vector<8x1xf32>
    %110 = vector.broadcast %109 : vector<8x1xf32> to vector<8x8xf32>
    %111 = arith.mulf %106, %110 : vector<8x8xf32>
    %cst_35 = arith.constant dense<0.000000e+00> : vector<8x8xf32>
    %112 = tpu.matmul %111, %100, %cst_35 {dimension_numbers = #tpu.dot_dimension_numbers<[1], [0], [0], [1], [0, 0, 1, 1], [], []>} : vector<8x8xf32>, vector<8x8xf32>, vector<8x8xf32> -> vector<8x8xf32>
    %113 = vector.extract_strided_slice %95 {offsets = [0, 8], sizes = [8, 8], strides = [1, 1]} : vector<8x32xf32> to vector<8x8xf32>
    %114 = vector.extract_strided_slice %96 {offsets = [0, 8], sizes = [8, 8], strides = [1, 1]} : vector<8x32xf32> to vector<8x8xf32>
    %115 = vector.extract_strided_slice %97 {offsets = [0, 8], sizes = [8, 8], strides = [1, 1]} : vector<8x32xf32> to vector<8x8xf32>
    %cst_36 = arith.constant dense<0.000000e+00> : vector<8x8xf32>
    %116 = tpu.matmul %113, %114, %cst_36 {dimension_numbers = #tpu.dot_dimension_numbers<[1], [1], [0], [0], [0, 0, 1, 0], [], []>} : vector<8x8xf32>, vector<8x8xf32>, vector<8x8xf32> -> vector<8x8xf32>
    %cst_37 = arith.constant dense<0xFF800000> : vector<8xf32>
    %117 = vector.multi_reduction <maximumf>, %116, %cst_37 [1] : vector<8x8xf32> to vector<8xf32>
    %118 = vector.shape_cast %117 : vector<8xf32> to vector<8x1xf32>
    %119 = vector.broadcast %118 : vector<8x1xf32> to vector<8x8xf32>
    %120 = arith.subf %116, %119 : vector<8x8xf32>
    %121 = math.exp %120 : vector<8x8xf32>
    %cst_38 = arith.constant dense<0.000000e+00> : vector<8xf32>
    %122 = vector.multi_reduction <add>, %121, %cst_38 [1] : vector<8x8xf32> to vector<8xf32>
    %123 = vector.shape_cast %122 : vector<8xf32> to vector<8x1xf32>
    %124 = tpu.reciprocal %123 {approx = true} : vector<8x1xf32> -> vector<8x1xf32>
    %125 = vector.broadcast %124 : vector<8x1xf32> to vector<8x8xf32>
    %126 = arith.mulf %121, %125 : vector<8x8xf32>
    %cst_39 = arith.constant dense<0.000000e+00> : vector<8x8xf32>
    %127 = tpu.matmul %126, %115, %cst_39 {dimension_numbers = #tpu.dot_dimension_numbers<[1], [0], [0], [1], [0, 0, 1, 1], [], []>} : vector<8x8xf32>, vector<8x8xf32>, vector<8x8xf32> -> vector<8x8xf32>
    %128 = vector.extract_strided_slice %95 {offsets = [0, 16], sizes = [8, 8], strides = [1, 1]} : vector<8x32xf32> to vector<8x8xf32>
    %129 = vector.extract_strided_slice %96 {offsets = [0, 16], sizes = [8, 8], strides = [1, 1]} : vector<8x32xf32> to vector<8x8xf32>
    %130 = vector.extract_strided_slice %97 {offsets = [0, 16], sizes = [8, 8], strides = [1, 1]} : vector<8x32xf32> to vector<8x8xf32>
    %cst_40 = arith.constant dense<0.000000e+00> : vector<8x8xf32>
    %131 = tpu.matmul %128, %129, %cst_40 {dimension_numbers = #tpu.dot_dimension_numbers<[1], [1], [0], [0], [0, 0, 1, 0], [], []>} : vector<8x8xf32>, vector<8x8xf32>, vector<8x8xf32> -> vector<8x8xf32>
    %cst_41 = arith.constant dense<0xFF800000> : vector<8xf32>
    %132 = vector.multi_reduction <maximumf>, %131, %cst_41 [1] : vector<8x8xf32> to vector<8xf32>
    %133 = vector.shape_cast %132 : vector<8xf32> to vector<8x1xf32>
    %134 = vector.broadcast %133 : vector<8x1xf32> to vector<8x8xf32>
    %135 = arith.subf %131, %134 : vector<8x8xf32>
    %136 = math.exp %135 : vector<8x8xf32>
    %cst_42 = arith.constant dense<0.000000e+00> : vector<8xf32>
    %137 = vector.multi_reduction <add>, %136, %cst_42 [1] : vector<8x8xf32> to vector<8xf32>
    %138 = vector.shape_cast %137 : vector<8xf32> to vector<8x1xf32>
    %139 = tpu.reciprocal %138 {approx = true} : vector<8x1xf32> -> vector<8x1xf32>
    %140 = vector.broadcast %139 : vector<8x1xf32> to vector<8x8xf32>
    %141 = arith.mulf %136, %140 : vector<8x8xf32>
    %cst_43 = arith.constant dense<0.000000e+00> : vector<8x8xf32>
    %142 = tpu.matmul %141, %130, %cst_43 {dimension_numbers = #tpu.dot_dimension_numbers<[1], [0], [0], [1], [0, 0, 1, 1], [], []>} : vector<8x8xf32>, vector<8x8xf32>, vector<8x8xf32> -> vector<8x8xf32>
    %143 = vector.extract_strided_slice %95 {offsets = [0, 24], sizes = [8, 8], strides = [1, 1]} : vector<8x32xf32> to vector<8x8xf32>
    %144 = vector.extract_strided_slice %96 {offsets = [0, 24], sizes = [8, 8], strides = [1, 1]} : vector<8x32xf32> to vector<8x8xf32>
    %145 = vector.extract_strided_slice %97 {offsets = [0, 24], sizes = [8, 8], strides = [1, 1]} : vector<8x32xf32> to vector<8x8xf32>
    %cst_44 = arith.constant dense<0.000000e+00> : vector<8x8xf32>
    %146 = tpu.matmul %143, %144, %cst_44 {dimension_numbers = #tpu.dot_dimension_numbers<[1], [1], [0], [0], [0, 0, 1, 0], [], []>} : vector<8x8xf32>, vector<8x8xf32>, vector<8x8xf32> -> vector<8x8xf32>
    %cst_45 = arith.constant dense<0xFF800000> : vector<8xf32>
    %147 = vector.multi_reduction <maximumf>, %146, %cst_45 [1] : vector<8x8xf32> to vector<8xf32>
    %148 = vector.shape_cast %147 : vector<8xf32> to vector<8x1xf32>
    %149 = vector.broadcast %148 : vector<8x1xf32> to vector<8x8xf32>
    %150 = arith.subf %146, %149 : vector<8x8xf32>
    %151 = math.exp %150 : vector<8x8xf32>
    %cst_46 = arith.constant dense<0.000000e+00> : vector<8xf32>
    %152 = vector.multi_reduction <add>, %151, %cst_46 [1] : vector<8x8xf32> to vector<8xf32>
    %153 = vector.shape_cast %152 : vector<8xf32> to vector<8x1xf32>
    %154 = tpu.reciprocal %153 {approx = true} : vector<8x1xf32> -> vector<8x1xf32>
    %155 = vector.broadcast %154 : vector<8x1xf32> to vector<8x8xf32>
    %156 = arith.mulf %151, %155 : vector<8x8xf32>
    %cst_47 = arith.constant dense<0.000000e+00> : vector<8x8xf32>
    %157 = tpu.matmul %156, %145, %cst_47 {dimension_numbers = #tpu.dot_dimension_numbers<[1], [0], [0], [1], [0, 0, 1, 1], [], []>} : vector<8x8xf32>, vector<8x8xf32>, vector<8x8xf32> -> vector<8x8xf32>
    %158 = tpu.concatenate %112, %127, %142, %157 in 1 : vector<8x8xf32>, vector<8x8xf32>, vector<8x8xf32>, vector<8x8xf32> -> vector<8x32xf32>
    %159 = tpu.concatenate %94, %158 in 0 : vector<8x32xf32>, vector<8x32xf32> -> vector<16x32xf32>
    %c0_48 = arith.constant 0 : index
    %c0_49 = arith.constant 0 : index
    %c0_50 = arith.constant 0 : index
    %160 = vector.load %arg5[%c0_48, %c0_49, %c0_50] : memref<2x32x32xbf16, #tpu.memory_space<vmem>>, vector<1x32x32xbf16>
    %161 = vector.shape_cast %160 : vector<1x32x32xbf16> to vector<32x32xbf16>
    %162 = arith.truncf %159 : vector<16x32xf32> to vector<16x32xbf16>
    %cst_51 = arith.constant dense<0.000000e+00> : vector<16x32xf32>
    %163 = tpu.matmul %162, %161, %cst_51 {dimension_numbers = #tpu.dot_dimension_numbers<[1], [0], [0], [1], [0, 0, 1, 1], [], []>} : vector<16x32xbf16>, vector<32x32xbf16>, vector<16x32xf32> -> vector<16x32xf32>
    %c0_52 = arith.constant 0 : index
    %c0_53 = arith.constant 0 : index
    %c0_54 = arith.constant 0 : index
    %164 = vector.load %arg6[%c0_52, %c0_53, %c0_54] : memref<2x1x32xf32, #tpu.memory_space<vmem>>, vector<1x1x32xf32>
    %165 = vector.shape_cast %164 : vector<1x1x32xf32> to vector<1x32xf32>
    %166 = vector.broadcast %165 : vector<1x32xf32> to vector<16x32xf32>
    %167 = arith.addf %163, %166 : vector<16x32xf32>
    %168 = arith.addf %22, %167 : vector<16x32xf32>
    %c0_55 = arith.constant 0 : index
    %c0_56 = arith.constant 0 : index
    %c0_57 = arith.constant 0 : index
    %169 = vector.load %arg7[%c0_55, %c0_56, %c0_57] : memref<2x1x32xf32, #tpu.memory_space<vmem>>, vector<1x1x32xf32>
    %170 = vector.shape_cast %169 : vector<1x1x32xf32> to vector<1x32xf32>
    %c0_58 = arith.constant 0 : index
    %c0_59 = arith.constant 0 : index
    %c0_60 = arith.constant 0 : index
    %171 = vector.load %arg8[%c0_58, %c0_59, %c0_60] : memref<2x1x32xf32, #tpu.memory_space<vmem>>, vector<1x1x32xf32>
    %172 = vector.shape_cast %171 : vector<1x1x32xf32> to vector<1x32xf32>
    %cst_61 = arith.constant dense<0.000000e+00> : vector<16xf32>
    %173 = vector.multi_reduction <add>, %168, %cst_61 [1] : vector<16x32xf32> to vector<16xf32>
    %174 = vector.shape_cast %173 : vector<16xf32> to vector<16x1xf32>
    %cst_62 = arith.constant 3.200000e+01 : f32
    %175 = vector.broadcast %cst_62 : f32 to vector<16x1xf32>
    %176 = arith.divf %174, %175 : vector<16x1xf32>
    %177 = vector.broadcast %176 : vector<16x1xf32> to vector<16x32xf32>
    %178 = arith.subf %168, %177 : vector<16x32xf32>
    %179 = arith.mulf %178, %178 : vector<16x32xf32>
    %cst_63 = arith.constant dense<0.000000e+00> : vector<16xf32>
    %180 = vector.multi_reduction <add>, %179, %cst_63 [1] : vector<16x32xf32> to vector<16xf32>
    %181 = vector.shape_cast %180 : vector<16xf32> to vector<16x1xf32>
    %cst_64 = arith.constant 3.200000e+01 : f32
    %182 = vector.broadcast %cst_64 : f32 to vector<16x1xf32>
    %183 = arith.divf %181, %182 : vector<16x1xf32>
    %cst_65 = arith.constant 9.99999996E-13 : f32
    %184 = vector.broadcast %cst_65 : f32 to vector<16x1xf32>
    %185 = arith.addf %183, %184 : vector<16x1xf32>
    %186 = math.rsqrt %185 : vector<16x1xf32>
    %187 = vector.broadcast %186 : vector<16x1xf32> to vector<16x32xf32>
    %188 = arith.mulf %178, %187 : vector<16x32xf32>
    %189 = vector.broadcast %170 : vector<1x32xf32> to vector<16x32xf32>
    %190 = arith.mulf %188, %189 : vector<16x32xf32>
    %191 = vector.broadcast %172 : vector<1x32xf32> to vector<16x32xf32>
    %192 = arith.addf %190, %191 : vector<16x32xf32>
    %c0_66 = arith.constant 0 : index
    %c0_67 = arith.constant 0 : index
    %c0_68 = arith.constant 0 : index
    %193 = vector.load %arg9[%c0_66, %c0_67, %c0_68] : memref<2x32x64xbf16, #tpu.memory_space<vmem>>, vector<1x32x64xbf16>
    %194 = vector.shape_cast %193 : vector<1x32x64xbf16> to vector<32x64xbf16>
    %195 = arith.truncf %192 : vector<16x32xf32> to vector<16x32xbf16>
    %cst_69 = arith.constant dense<0.000000e+00> : vector<16x64xf32>
    %196 = tpu.matmul %195, %194, %cst_69 {dimension_numbers = #tpu.dot_dimension_numbers<[1], [0], [0], [1], [0, 0, 1, 1], [], []>} : vector<16x32xbf16>, vector<32x64xbf16>, vector<16x64xf32> -> vector<16x64xf32>
    %c0_70 = arith.constant 0 : index
    %c0_71 = arith.constant 0 : index
    %c0_72 = arith.constant 0 : index
    %197 = vector.load %arg10[%c0_70, %c0_71, %c0_72] : memref<2x1x64xf32, #tpu.memory_space<vmem>>, vector<1x1x64xf32>
    %198 = vector.shape_cast %197 : vector<1x1x64xf32> to vector<1x64xf32>
    %199 = vector.broadcast %198 : vector<1x64xf32> to vector<16x64xf32>
    %200 = arith.addf %196, %199 : vector<16x64xf32>
    %cst_73 = arith.constant 5.000000e-01 : f32
    %201 = vector.broadcast %cst_73 : f32 to vector<16x64xf32>
    %202 = arith.mulf %201, %200 : vector<16x64xf32>
    %cst_74 = arith.constant 0.707106769 : f32
    %203 = vector.broadcast %cst_74 : f32 to vector<16x64xf32>
    %204 = arith.mulf %200, %203 : vector<16x64xf32>
    %cst_75 = arith.constant 0.000000e+00 : f32
    %205 = vector.broadcast %cst_75 : f32 to vector<16x64xf32>
    %206 = arith.cmpf oge, %204, %205 : vector<16x64xf32>
    %cst_76 = arith.constant 1.000000e+00 : f32
    %cst_77 = arith.constant -1.000000e+00 : f32
    %207 = vector.broadcast %cst_76 : f32 to vector<16x64xf32>
    %208 = vector.broadcast %cst_77 : f32 to vector<16x64xf32>
    %209 = arith.select %206, %207, %208 : vector<16x64xi1>, vector<16x64xf32>
    %210 = math.absf %204 : vector<16x64xf32>
    %cst_78 = arith.constant 0.327591091 : f32
    %211 = vector.broadcast %cst_78 : f32 to vector<16x64xf32>
    %212 = arith.mulf %211, %210 : vector<16x64xf32>
    %cst_79 = arith.constant 1.000000e+00 : f32
    %213 = vector.broadcast %cst_79 : f32 to vector<16x64xf32>
    %214 = arith.addf %213, %212 : vector<16x64xf32>
    %cst_80 = arith.constant 1.000000e+00 : f32
    %215 = vector.broadcast %cst_80 : f32 to vector<16x64xf32>
    %216 = arith.divf %215, %214 : vector<16x64xf32>
    %cst_81 = arith.constant 1.06140542 : f32
    %217 = vector.broadcast %cst_81 : f32 to vector<16x64xf32>
    %218 = arith.mulf %217, %216 : vector<16x64xf32>
    %cst_82 = arith.constant -1.45315206 : f32
    %219 = vector.broadcast %cst_82 : f32 to vector<16x64xf32>
    %220 = arith.addf %218, %219 : vector<16x64xf32>
    %221 = arith.mulf %220, %216 : vector<16x64xf32>
    %cst_83 = arith.constant 1.42141378 : f32
    %222 = vector.broadcast %cst_83 : f32 to vector<16x64xf32>
    %223 = arith.addf %221, %222 : vector<16x64xf32>
    %224 = arith.mulf %223, %216 : vector<16x64xf32>
    %cst_84 = arith.constant -0.284496725 : f32
    %225 = vector.broadcast %cst_84 : f32 to vector<16x64xf32>
    %226 = arith.addf %224, %225 : vector<16x64xf32>
    %227 = arith.mulf %226, %216 : vector<16x64xf32>
    %cst_85 = arith.constant 0.254829586 : f32
    %228 = vector.broadcast %cst_85 : f32 to vector<16x64xf32>
    %229 = arith.addf %227, %228 : vector<16x64xf32>
    %230 = arith.mulf %229, %216 : vector<16x64xf32>
    %cst_86 = arith.constant 0.000000e+00 : f32
    %231 = vector.broadcast %cst_86 : f32 to vector<16x64xf32>
    %232 = arith.subf %231, %210 : vector<16x64xf32>
    %233 = arith.mulf %232, %210 : vector<16x64xf32>
    %234 = math.exp %233 : vector<16x64xf32>
    %235 = arith.mulf %230, %234 : vector<16x64xf32>
    %cst_87 = arith.constant 1.000000e+00 : f32
    %236 = vector.broadcast %cst_87 : f32 to vector<16x64xf32>
    %237 = arith.subf %236, %235 : vector<16x64xf32>
    %238 = arith.mulf %209, %237 : vector<16x64xf32>
    %cst_88 = arith.constant 1.000000e+00 : f32
    %239 = vector.broadcast %cst_88 : f32 to vector<16x64xf32>
    %240 = arith.addf %239, %238 : vector<16x64xf32>
    %241 = arith.mulf %202, %240 : vector<16x64xf32>
    %c0_89 = arith.constant 0 : index
    %c0_90 = arith.constant 0 : index
    %c0_91 = arith.constant 0 : index
    %242 = vector.load %arg11[%c0_89, %c0_90, %c0_91] : memref<2x64x32xbf16, #tpu.memory_space<vmem>>, vector<1x64x32xbf16>
    %243 = vector.shape_cast %242 : vector<1x64x32xbf16> to vector<64x32xbf16>
    %244 = arith.truncf %241 : vector<16x64xf32> to vector<16x64xbf16>
    %cst_92 = arith.constant dense<0.000000e+00> : vector<16x32xf32>
    %245 = tpu.matmul %244, %243, %cst_92 {dimension_numbers = #tpu.dot_dimension_numbers<[1], [0], [0], [1], [0, 0, 1, 1], [], []>} : vector<16x64xbf16>, vector<64x32xbf16>, vector<16x32xf32> -> vector<16x32xf32>
    %c0_93 = arith.constant 0 : index
    %c0_94 = arith.constant 0 : index
    %c0_95 = arith.constant 0 : index
    %246 = vector.load %arg12[%c0_93, %c0_94, %c0_95] : memref<2x1x32xf32, #tpu.memory_space<vmem>>, vector<1x1x32xf32>
    %247 = vector.shape_cast %246 : vector<1x1x32xf32> to vector<1x32xf32>
    %248 = vector.broadcast %247 : vector<1x32xf32> to vector<16x32xf32>
    %249 = arith.addf %245, %248 : vector<16x32xf32>
    %250 = arith.addf %192, %249 : vector<16x32xf32>
    %c0_96 = arith.constant 0 : index
    %c0_97 = arith.constant 0 : index
    %c0_98 = arith.constant 0 : index
    %251 = vector.load %arg13[%c0_96, %c0_97, %c0_98] : memref<2x1x32xf32, #tpu.memory_space<vmem>>, vector<1x1x32xf32>
    %252 = vector.shape_cast %251 : vector<1x1x32xf32> to vector<1x32xf32>
    %c0_99 = arith.constant 0 : index
    %c0_100 = arith.constant 0 : index
    %c0_101 = arith.constant 0 : index
    %253 = vector.load %arg14[%c0_99, %c0_100, %c0_101] : memref<2x1x32xf32, #tpu.memory_space<vmem>>, vector<1x1x32xf32>
    %254 = vector.shape_cast %253 : vector<1x1x32xf32> to vector<1x32xf32>
    %cst_102 = arith.constant dense<0.000000e+00> : vector<16xf32>
    %255 = vector.multi_reduction <add>, %250, %cst_102 [1] : vector<16x32xf32> to vector<16xf32>
    %256 = vector.shape_cast %255 : vector<16xf32> to vector<16x1xf32>
    %cst_103 = arith.constant 3.200000e+01 : f32
    %257 = vector.broadcast %cst_103 : f32 to vector<16x1xf32>
    %258 = arith.divf %256, %257 : vector<16x1xf32>
    %259 = vector.broadcast %258 : vector<16x1xf32> to vector<16x32xf32>
    %260 = arith.subf %250, %259 : vector<16x32xf32>
    %261 = arith.mulf %260, %260 : vector<16x32xf32>
    %cst_104 = arith.constant dense<0.000000e+00> : vector<16xf32>
    %262 = vector.multi_reduction <add>, %261, %cst_104 [1] : vector<16x32xf32> to vector<16xf32>
    %263 = vector.shape_cast %262 : vector<16xf32> to vector<16x1xf32>
    %cst_105 = arith.constant 3.200000e+01 : f32
    %264 = vector.broadcast %cst_105 : f32 to vector<16x1xf32>
    %265 = arith.divf %263, %264 : vector<16x1xf32>
    %cst_106 = arith.constant 9.99999996E-13 : f32
    %266 = vector.broadcast %cst_106 : f32 to vector<16x1xf32>
    %267 = arith.addf %265, %266 : vector<16x1xf32>
    %268 = math.rsqrt %267 : vector<16x1xf32>
    %269 = vector.broadcast %268 : vector<16x1xf32> to vector<16x32xf32>
    %270 = arith.mulf %260, %269 : vector<16x32xf32>
    %271 = vector.broadcast %252 : vector<1x32xf32> to vector<16x32xf32>
    %272 = arith.mulf %270, %271 : vector<16x32xf32>
    %273 = vector.broadcast %254 : vector<1x32xf32> to vector<16x32xf32>
    %274 = arith.addf %272, %273 : vector<16x32xf32>
    %c1 = arith.constant 1 : index
    %c0_107 = arith.constant 0 : index
    %c0_108 = arith.constant 0 : index
    %275 = vector.load %arg3[%c1, %c0_107, %c0_108] : memref<2x32x96xbf16, #tpu.memory_space<vmem>>, vector<1x32x96xbf16>
    %276 = vector.shape_cast %275 : vector<1x32x96xbf16> to vector<32x96xbf16>
    %277 = arith.truncf %274 : vector<16x32xf32> to vector<16x32xbf16>
    %cst_109 = arith.constant dense<0.000000e+00> : vector<16x96xf32>
    %278 = tpu.matmul %277, %276, %cst_109 {dimension_numbers = #tpu.dot_dimension_numbers<[1], [0], [0], [1], [0, 0, 1, 1], [], []>} : vector<16x32xbf16>, vector<32x96xbf16>, vector<16x96xf32> -> vector<16x96xf32>
    %c1_110 = arith.constant 1 : index
    %c0_111 = arith.constant 0 : index
    %c0_112 = arith.constant 0 : index
    %279 = vector.load %arg4[%c1_110, %c0_111, %c0_112] : memref<2x1x96xf32, #tpu.memory_space<vmem>>, vector<1x1x96xf32>
    %280 = vector.shape_cast %279 : vector<1x1x96xf32> to vector<1x96xf32>
    %281 = vector.broadcast %280 : vector<1x96xf32> to vector<16x96xf32>
    %282 = arith.addf %278, %281 : vector<16x96xf32>
    %283 = vector.extract_strided_slice %282 {offsets = [0, 0], sizes = [8, 32], strides = [1, 1]} : vector<16x96xf32> to vector<8x32xf32>
    %284 = vector.extract_strided_slice %282 {offsets = [0, 32], sizes = [8, 32], strides = [1, 1]} : vector<16x96xf32> to vector<8x32xf32>
    %285 = vector.extract_strided_slice %282 {offsets = [0, 64], sizes = [8, 32], strides = [1, 1]} : vector<16x96xf32> to vector<8x32xf32>
    %286 = vector.extract_strided_slice %283 {offsets = [0, 0], sizes = [8, 8], strides = [1, 1]} : vector<8x32xf32> to vector<8x8xf32>
    %287 = vector.extract_strided_slice %284 {offsets = [0, 0], sizes = [8, 8], strides = [1, 1]} : vector<8x32xf32> to vector<8x8xf32>
    %288 = vector.extract_strided_slice %285 {offsets = [0, 0], sizes = [8, 8], strides = [1, 1]} : vector<8x32xf32> to vector<8x8xf32>
    %cst_113 = arith.constant dense<0.000000e+00> : vector<8x8xf32>
    %289 = tpu.matmul %286, %287, %cst_113 {dimension_numbers = #tpu.dot_dimension_numbers<[1], [1], [0], [0], [0, 0, 1, 0], [], []>} : vector<8x8xf32>, vector<8x8xf32>, vector<8x8xf32> -> vector<8x8xf32>
    %cst_114 = arith.constant dense<0xFF800000> : vector<8xf32>
    %290 = vector.multi_reduction <maximumf>, %289, %cst_114 [1] : vector<8x8xf32> to vector<8xf32>
    %291 = vector.shape_cast %290 : vector<8xf32> to vector<8x1xf32>
    %292 = vector.broadcast %291 : vector<8x1xf32> to vector<8x8xf32>
    %293 = arith.subf %289, %292 : vector<8x8xf32>
    %294 = math.exp %293 : vector<8x8xf32>
    %cst_115 = arith.constant dense<0.000000e+00> : vector<8xf32>
    %295 = vector.multi_reduction <add>, %294, %cst_115 [1] : vector<8x8xf32> to vector<8xf32>
    %296 = vector.shape_cast %295 : vector<8xf32> to vector<8x1xf32>
    %297 = tpu.reciprocal %296 {approx = true} : vector<8x1xf32> -> vector<8x1xf32>
    %298 = vector.broadcast %297 : vector<8x1xf32> to vector<8x8xf32>
    %299 = arith.mulf %294, %298 : vector<8x8xf32>
    %cst_116 = arith.constant dense<0.000000e+00> : vector<8x8xf32>
    %300 = tpu.matmul %299, %288, %cst_116 {dimension_numbers = #tpu.dot_dimension_numbers<[1], [0], [0], [1], [0, 0, 1, 1], [], []>} : vector<8x8xf32>, vector<8x8xf32>, vector<8x8xf32> -> vector<8x8xf32>
    %301 = vector.extract_strided_slice %283 {offsets = [0, 8], sizes = [8, 8], strides = [1, 1]} : vector<8x32xf32> to vector<8x8xf32>
    %302 = vector.extract_strided_slice %284 {offsets = [0, 8], sizes = [8, 8], strides = [1, 1]} : vector<8x32xf32> to vector<8x8xf32>
    %303 = vector.extract_strided_slice %285 {offsets = [0, 8], sizes = [8, 8], strides = [1, 1]} : vector<8x32xf32> to vector<8x8xf32>
    %cst_117 = arith.constant dense<0.000000e+00> : vector<8x8xf32>
    %304 = tpu.matmul %301, %302, %cst_117 {dimension_numbers = #tpu.dot_dimension_numbers<[1], [1], [0], [0], [0, 0, 1, 0], [], []>} : vector<8x8xf32>, vector<8x8xf32>, vector<8x8xf32> -> vector<8x8xf32>
    %cst_118 = arith.constant dense<0xFF800000> : vector<8xf32>
    %305 = vector.multi_reduction <maximumf>, %304, %cst_118 [1] : vector<8x8xf32> to vector<8xf32>
    %306 = vector.shape_cast %305 : vector<8xf32> to vector<8x1xf32>
    %307 = vector.broadcast %306 : vector<8x1xf32> to vector<8x8xf32>
    %308 = arith.subf %304, %307 : vector<8x8xf32>
    %309 = math.exp %308 : vector<8x8xf32>
    %cst_119 = arith.constant dense<0.000000e+00> : vector<8xf32>
    %310 = vector.multi_reduction <add>, %309, %cst_119 [1] : vector<8x8xf32> to vector<8xf32>
    %311 = vector.shape_cast %310 : vector<8xf32> to vector<8x1xf32>
    %312 = tpu.reciprocal %311 {approx = true} : vector<8x1xf32> -> vector<8x1xf32>
    %313 = vector.broadcast %312 : vector<8x1xf32> to vector<8x8xf32>
    %314 = arith.mulf %309, %313 : vector<8x8xf32>
    %cst_120 = arith.constant dense<0.000000e+00> : vector<8x8xf32>
    %315 = tpu.matmul %314, %303, %cst_120 {dimension_numbers = #tpu.dot_dimension_numbers<[1], [0], [0], [1], [0, 0, 1, 1], [], []>} : vector<8x8xf32>, vector<8x8xf32>, vector<8x8xf32> -> vector<8x8xf32>
    %316 = vector.extract_strided_slice %283 {offsets = [0, 16], sizes = [8, 8], strides = [1, 1]} : vector<8x32xf32> to vector<8x8xf32>
    %317 = vector.extract_strided_slice %284 {offsets = [0, 16], sizes = [8, 8], strides = [1, 1]} : vector<8x32xf32> to vector<8x8xf32>
    %318 = vector.extract_strided_slice %285 {offsets = [0, 16], sizes = [8, 8], strides = [1, 1]} : vector<8x32xf32> to vector<8x8xf32>
    %cst_121 = arith.constant dense<0.000000e+00> : vector<8x8xf32>
    %319 = tpu.matmul %316, %317, %cst_121 {dimension_numbers = #tpu.dot_dimension_numbers<[1], [1], [0], [0], [0, 0, 1, 0], [], []>} : vector<8x8xf32>, vector<8x8xf32>, vector<8x8xf32> -> vector<8x8xf32>
    %cst_122 = arith.constant dense<0xFF800000> : vector<8xf32>
    %320 = vector.multi_reduction <maximumf>, %319, %cst_122 [1] : vector<8x8xf32> to vector<8xf32>
    %321 = vector.shape_cast %320 : vector<8xf32> to vector<8x1xf32>
    %322 = vector.broadcast %321 : vector<8x1xf32> to vector<8x8xf32>
    %323 = arith.subf %319, %322 : vector<8x8xf32>
    %324 = math.exp %323 : vector<8x8xf32>
    %cst_123 = arith.constant dense<0.000000e+00> : vector<8xf32>
    %325 = vector.multi_reduction <add>, %324, %cst_123 [1] : vector<8x8xf32> to vector<8xf32>
    %326 = vector.shape_cast %325 : vector<8xf32> to vector<8x1xf32>
    %327 = tpu.reciprocal %326 {approx = true} : vector<8x1xf32> -> vector<8x1xf32>
    %328 = vector.broadcast %327 : vector<8x1xf32> to vector<8x8xf32>
    %329 = arith.mulf %324, %328 : vector<8x8xf32>
    %cst_124 = arith.constant dense<0.000000e+00> : vector<8x8xf32>
    %330 = tpu.matmul %329, %318, %cst_124 {dimension_numbers = #tpu.dot_dimension_numbers<[1], [0], [0], [1], [0, 0, 1, 1], [], []>} : vector<8x8xf32>, vector<8x8xf32>, vector<8x8xf32> -> vector<8x8xf32>
    %331 = vector.extract_strided_slice %283 {offsets = [0, 24], sizes = [8, 8], strides = [1, 1]} : vector<8x32xf32> to vector<8x8xf32>
    %332 = vector.extract_strided_slice %284 {offsets = [0, 24], sizes = [8, 8], strides = [1, 1]} : vector<8x32xf32> to vector<8x8xf32>
    %333 = vector.extract_strided_slice %285 {offsets = [0, 24], sizes = [8, 8], strides = [1, 1]} : vector<8x32xf32> to vector<8x8xf32>
    %cst_125 = arith.constant dense<0.000000e+00> : vector<8x8xf32>
    %334 = tpu.matmul %331, %332, %cst_125 {dimension_numbers = #tpu.dot_dimension_numbers<[1], [1], [0], [0], [0, 0, 1, 0], [], []>} : vector<8x8xf32>, vector<8x8xf32>, vector<8x8xf32> -> vector<8x8xf32>
    %cst_126 = arith.constant dense<0xFF800000> : vector<8xf32>
    %335 = vector.multi_reduction <maximumf>, %334, %cst_126 [1] : vector<8x8xf32> to vector<8xf32>
    %336 = vector.shape_cast %335 : vector<8xf32> to vector<8x1xf32>
    %337 = vector.broadcast %336 : vector<8x1xf32> to vector<8x8xf32>
    %338 = arith.subf %334, %337 : vector<8x8xf32>
    %339 = math.exp %338 : vector<8x8xf32>
    %cst_127 = arith.constant dense<0.000000e+00> : vector<8xf32>
    %340 = vector.multi_reduction <add>, %339, %cst_127 [1] : vector<8x8xf32> to vector<8xf32>
    %341 = vector.shape_cast %340 : vector<8xf32> to vector<8x1xf32>
    %342 = tpu.reciprocal %341 {approx = true} : vector<8x1xf32> -> vector<8x1xf32>
    %343 = vector.broadcast %342 : vector<8x1xf32> to vector<8x8xf32>
    %344 = arith.mulf %339, %343 : vector<8x8xf32>
    %cst_128 = arith.constant dense<0.000000e+00> : vector<8x8xf32>
    %345 = tpu.matmul %344, %333, %cst_128 {dimension_numbers = #tpu.dot_dimension_numbers<[1], [0], [0], [1], [0, 0, 1, 1], [], []>} : vector<8x8xf32>, vector<8x8xf32>, vector<8x8xf32> -> vector<8x8xf32>
    %346 = tpu.concatenate %300, %315, %330, %345 in 1 : vector<8x8xf32>, vector<8x8xf32>, vector<8x8xf32>, vector<8x8xf32> -> vector<8x32xf32>
    %347 = vector.extract_strided_slice %282 {offsets = [8, 0], sizes = [8, 32], strides = [1, 1]} : vector<16x96xf32> to vector<8x32xf32>
    %348 = vector.extract_strided_slice %282 {offsets = [8, 32], sizes = [8, 32], strides = [1, 1]} : vector<16x96xf32> to vector<8x32xf32>
    %349 = vector.extract_strided_slice %282 {offsets = [8, 64], sizes = [8, 32], strides = [1, 1]} : vector<16x96xf32> to vector<8x32xf32>
    %350 = vector.extract_strided_slice %347 {offsets = [0, 0], sizes = [8, 8], strides = [1, 1]} : vector<8x32xf32> to vector<8x8xf32>
    %351 = vector.extract_strided_slice %348 {offsets = [0, 0], sizes = [8, 8], strides = [1, 1]} : vector<8x32xf32> to vector<8x8xf32>
    %352 = vector.extract_strided_slice %349 {offsets = [0, 0], sizes = [8, 8], strides = [1, 1]} : vector<8x32xf32> to vector<8x8xf32>
    %cst_129 = arith.constant dense<0.000000e+00> : vector<8x8xf32>
    %353 = tpu.matmul %350, %351, %cst_129 {dimension_numbers = #tpu.dot_dimension_numbers<[1], [1], [0], [0], [0, 0, 1, 0], [], []>} : vector<8x8xf32>, vector<8x8xf32>, vector<8x8xf32> -> vector<8x8xf32>
    %cst_130 = arith.constant dense<0xFF800000> : vector<8xf32>
    %354 = vector.multi_reduction <maximumf>, %353, %cst_130 [1] : vector<8x8xf32> to vector<8xf32>
    %355 = vector.shape_cast %354 : vector<8xf32> to vector<8x1xf32>
    %356 = vector.broadcast %355 : vector<8x1xf32> to vector<8x8xf32>
    %357 = arith.subf %353, %356 : vector<8x8xf32>
    %358 = math.exp %357 : vector<8x8xf32>
    %cst_131 = arith.constant dense<0.000000e+00> : vector<8xf32>
    %359 = vector.multi_reduction <add>, %358, %cst_131 [1] : vector<8x8xf32> to vector<8xf32>
    %360 = vector.shape_cast %359 : vector<8xf32> to vector<8x1xf32>
    %361 = tpu.reciprocal %360 {approx = true} : vector<8x1xf32> -> vector<8x1xf32>
    %362 = vector.broadcast %361 : vector<8x1xf32> to vector<8x8xf32>
    %363 = arith.mulf %358, %362 : vector<8x8xf32>
    %cst_132 = arith.constant dense<0.000000e+00> : vector<8x8xf32>
    %364 = tpu.matmul %363, %352, %cst_132 {dimension_numbers = #tpu.dot_dimension_numbers<[1], [0], [0], [1], [0, 0, 1, 1], [], []>} : vector<8x8xf32>, vector<8x8xf32>, vector<8x8xf32> -> vector<8x8xf32>
    %365 = vector.extract_strided_slice %347 {offsets = [0, 8], sizes = [8, 8], strides = [1, 1]} : vector<8x32xf32> to vector<8x8xf32>
    %366 = vector.extract_strided_slice %348 {offsets = [0, 8], sizes = [8, 8], strides = [1, 1]} : vector<8x32xf32> to vector<8x8xf32>
    %367 = vector.extract_strided_slice %349 {offsets = [0, 8], sizes = [8, 8], strides = [1, 1]} : vector<8x32xf32> to vector<8x8xf32>
    %cst_133 = arith.constant dense<0.000000e+00> : vector<8x8xf32>
    %368 = tpu.matmul %365, %366, %cst_133 {dimension_numbers = #tpu.dot_dimension_numbers<[1], [1], [0], [0], [0, 0, 1, 0], [], []>} : vector<8x8xf32>, vector<8x8xf32>, vector<8x8xf32> -> vector<8x8xf32>
    %cst_134 = arith.constant dense<0xFF800000> : vector<8xf32>
    %369 = vector.multi_reduction <maximumf>, %368, %cst_134 [1] : vector<8x8xf32> to vector<8xf32>
    %370 = vector.shape_cast %369 : vector<8xf32> to vector<8x1xf32>
    %371 = vector.broadcast %370 : vector<8x1xf32> to vector<8x8xf32>
    %372 = arith.subf %368, %371 : vector<8x8xf32>
    %373 = math.exp %372 : vector<8x8xf32>
    %cst_135 = arith.constant dense<0.000000e+00> : vector<8xf32>
    %374 = vector.multi_reduction <add>, %373, %cst_135 [1] : vector<8x8xf32> to vector<8xf32>
    %375 = vector.shape_cast %374 : vector<8xf32> to vector<8x1xf32>
    %376 = tpu.reciprocal %375 {approx = true} : vector<8x1xf32> -> vector<8x1xf32>
    %377 = vector.broadcast %376 : vector<8x1xf32> to vector<8x8xf32>
    %378 = arith.mulf %373, %377 : vector<8x8xf32>
    %cst_136 = arith.constant dense<0.000000e+00> : vector<8x8xf32>
    %379 = tpu.matmul %378, %367, %cst_136 {dimension_numbers = #tpu.dot_dimension_numbers<[1], [0], [0], [1], [0, 0, 1, 1], [], []>} : vector<8x8xf32>, vector<8x8xf32>, vector<8x8xf32> -> vector<8x8xf32>
    %380 = vector.extract_strided_slice %347 {offsets = [0, 16], sizes = [8, 8], strides = [1, 1]} : vector<8x32xf32> to vector<8x8xf32>
    %381 = vector.extract_strided_slice %348 {offsets = [0, 16], sizes = [8, 8], strides = [1, 1]} : vector<8x32xf32> to vector<8x8xf32>
    %382 = vector.extract_strided_slice %349 {offsets = [0, 16], sizes = [8, 8], strides = [1, 1]} : vector<8x32xf32> to vector<8x8xf32>
    %cst_137 = arith.constant dense<0.000000e+00> : vector<8x8xf32>
    %383 = tpu.matmul %380, %381, %cst_137 {dimension_numbers = #tpu.dot_dimension_numbers<[1], [1], [0], [0], [0, 0, 1, 0], [], []>} : vector<8x8xf32>, vector<8x8xf32>, vector<8x8xf32> -> vector<8x8xf32>
    %cst_138 = arith.constant dense<0xFF800000> : vector<8xf32>
    %384 = vector.multi_reduction <maximumf>, %383, %cst_138 [1] : vector<8x8xf32> to vector<8xf32>
    %385 = vector.shape_cast %384 : vector<8xf32> to vector<8x1xf32>
    %386 = vector.broadcast %385 : vector<8x1xf32> to vector<8x8xf32>
    %387 = arith.subf %383, %386 : vector<8x8xf32>
    %388 = math.exp %387 : vector<8x8xf32>
    %cst_139 = arith.constant dense<0.000000e+00> : vector<8xf32>
    %389 = vector.multi_reduction <add>, %388, %cst_139 [1] : vector<8x8xf32> to vector<8xf32>
    %390 = vector.shape_cast %389 : vector<8xf32> to vector<8x1xf32>
    %391 = tpu.reciprocal %390 {approx = true} : vector<8x1xf32> -> vector<8x1xf32>
    %392 = vector.broadcast %391 : vector<8x1xf32> to vector<8x8xf32>
    %393 = arith.mulf %388, %392 : vector<8x8xf32>
    %cst_140 = arith.constant dense<0.000000e+00> : vector<8x8xf32>
    %394 = tpu.matmul %393, %382, %cst_140 {dimension_numbers = #tpu.dot_dimension_numbers<[1], [0], [0], [1], [0, 0, 1, 1], [], []>} : vector<8x8xf32>, vector<8x8xf32>, vector<8x8xf32> -> vector<8x8xf32>
    %395 = vector.extract_strided_slice %347 {offsets = [0, 24], sizes = [8, 8], strides = [1, 1]} : vector<8x32xf32> to vector<8x8xf32>
    %396 = vector.extract_strided_slice %348 {offsets = [0, 24], sizes = [8, 8], strides = [1, 1]} : vector<8x32xf32> to vector<8x8xf32>
    %397 = vector.extract_strided_slice %349 {offsets = [0, 24], sizes = [8, 8], strides = [1, 1]} : vector<8x32xf32> to vector<8x8xf32>
    %cst_141 = arith.constant dense<0.000000e+00> : vector<8x8xf32>
    %398 = tpu.matmul %395, %396, %cst_141 {dimension_numbers = #tpu.dot_dimension_numbers<[1], [1], [0], [0], [0, 0, 1, 0], [], []>} : vector<8x8xf32>, vector<8x8xf32>, vector<8x8xf32> -> vector<8x8xf32>
    %cst_142 = arith.constant dense<0xFF800000> : vector<8xf32>
    %399 = vector.multi_reduction <maximumf>, %398, %cst_142 [1] : vector<8x8xf32> to vector<8xf32>
    %400 = vector.shape_cast %399 : vector<8xf32> to vector<8x1xf32>
    %401 = vector.broadcast %400 : vector<8x1xf32> to vector<8x8xf32>
    %402 = arith.subf %398, %401 : vector<8x8xf32>
    %403 = math.exp %402 : vector<8x8xf32>
    %cst_143 = arith.constant dense<0.000000e+00> : vector<8xf32>
    %404 = vector.multi_reduction <add>, %403, %cst_143 [1] : vector<8x8xf32> to vector<8xf32>
    %405 = vector.shape_cast %404 : vector<8xf32> to vector<8x1xf32>
    %406 = tpu.reciprocal %405 {approx = true} : vector<8x1xf32> -> vector<8x1xf32>
    %407 = vector.broadcast %406 : vector<8x1xf32> to vector<8x8xf32>
    %408 = arith.mulf %403, %407 : vector<8x8xf32>
    %cst_144 = arith.constant dense<0.000000e+00> : vector<8x8xf32>
    %409 = tpu.matmul %408, %397, %cst_144 {dimension_numbers = #tpu.dot_dimension_numbers<[1], [0], [0], [1], [0, 0, 1, 1], [], []>} : vector<8x8xf32>, vector<8x8xf32>, vector<8x8xf32> -> vector<8x8xf32>
    %410 = tpu.concatenate %364, %379, %394, %409 in 1 : vector<8x8xf32>, vector<8x8xf32>, vector<8x8xf32>, vector<8x8xf32> -> vector<8x32xf32>
    %411 = tpu.concatenate %346, %410 in 0 : vector<8x32xf32>, vector<8x32xf32> -> vector<16x32xf32>
    %c1_145 = arith.constant 1 : index
    %c0_146 = arith.constant 0 : index
    %c0_147 = arith.constant 0 : index
    %412 = vector.load %arg5[%c1_145, %c0_146, %c0_147] : memref<2x32x32xbf16, #tpu.memory_space<vmem>>, vector<1x32x32xbf16>
    %413 = vector.shape_cast %412 : vector<1x32x32xbf16> to vector<32x32xbf16>
    %414 = arith.truncf %411 : vector<16x32xf32> to vector<16x32xbf16>
    %cst_148 = arith.constant dense<0.000000e+00> : vector<16x32xf32>
    %415 = tpu.matmul %414, %413, %cst_148 {dimension_numbers = #tpu.dot_dimension_numbers<[1], [0], [0], [1], [0, 0, 1, 1], [], []>} : vector<16x32xbf16>, vector<32x32xbf16>, vector<16x32xf32> -> vector<16x32xf32>
    %c1_149 = arith.constant 1 : index
    %c0_150 = arith.constant 0 : index
    %c0_151 = arith.constant 0 : index
    %416 = vector.load %arg6[%c1_149, %c0_150, %c0_151] : memref<2x1x32xf32, #tpu.memory_space<vmem>>, vector<1x1x32xf32>
    %417 = vector.shape_cast %416 : vector<1x1x32xf32> to vector<1x32xf32>
    %418 = vector.broadcast %417 : vector<1x32xf32> to vector<16x32xf32>
    %419 = arith.addf %415, %418 : vector<16x32xf32>
    %420 = arith.addf %274, %419 : vector<16x32xf32>
    %c1_152 = arith.constant 1 : index
    %c0_153 = arith.constant 0 : index
    %c0_154 = arith.constant 0 : index
    %421 = vector.load %arg7[%c1_152, %c0_153, %c0_154] : memref<2x1x32xf32, #tpu.memory_space<vmem>>, vector<1x1x32xf32>
    %422 = vector.shape_cast %421 : vector<1x1x32xf32> to vector<1x32xf32>
    %c1_155 = arith.constant 1 : index
    %c0_156 = arith.constant 0 : index
    %c0_157 = arith.constant 0 : index
    %423 = vector.load %arg8[%c1_155, %c0_156, %c0_157] : memref<2x1x32xf32, #tpu.memory_space<vmem>>, vector<1x1x32xf32>
    %424 = vector.shape_cast %423 : vector<1x1x32xf32> to vector<1x32xf32>
    %cst_158 = arith.constant dense<0.000000e+00> : vector<16xf32>
    %425 = vector.multi_reduction <add>, %420, %cst_158 [1] : vector<16x32xf32> to vector<16xf32>
    %426 = vector.shape_cast %425 : vector<16xf32> to vector<16x1xf32>
    %cst_159 = arith.constant 3.200000e+01 : f32
    %427 = vector.broadcast %cst_159 : f32 to vector<16x1xf32>
    %428 = arith.divf %426, %427 : vector<16x1xf32>
    %429 = vector.broadcast %428 : vector<16x1xf32> to vector<16x32xf32>
    %430 = arith.subf %420, %429 : vector<16x32xf32>
    %431 = arith.mulf %430, %430 : vector<16x32xf32>
    %cst_160 = arith.constant dense<0.000000e+00> : vector<16xf32>
    %432 = vector.multi_reduction <add>, %431, %cst_160 [1] : vector<16x32xf32> to vector<16xf32>
    %433 = vector.shape_cast %432 : vector<16xf32> to vector<16x1xf32>
    %cst_161 = arith.constant 3.200000e+01 : f32
    %434 = vector.broadcast %cst_161 : f32 to vector<16x1xf32>
    %435 = arith.divf %433, %434 : vector<16x1xf32>
    %cst_162 = arith.constant 9.99999996E-13 : f32
    %436 = vector.broadcast %cst_162 : f32 to vector<16x1xf32>
    %437 = arith.addf %435, %436 : vector<16x1xf32>
    %438 = math.rsqrt %437 : vector<16x1xf32>
    %439 = vector.broadcast %438 : vector<16x1xf32> to vector<16x32xf32>
    %440 = arith.mulf %430, %439 : vector<16x32xf32>
    %441 = vector.broadcast %422 : vector<1x32xf32> to vector<16x32xf32>
    %442 = arith.mulf %440, %441 : vector<16x32xf32>
    %443 = vector.broadcast %424 : vector<1x32xf32> to vector<16x32xf32>
    %444 = arith.addf %442, %443 : vector<16x32xf32>
    %c1_163 = arith.constant 1 : index
    %c0_164 = arith.constant 0 : index
    %c0_165 = arith.constant 0 : index
    %445 = vector.load %arg9[%c1_163, %c0_164, %c0_165] : memref<2x32x64xbf16, #tpu.memory_space<vmem>>, vector<1x32x64xbf16>
    %446 = vector.shape_cast %445 : vector<1x32x64xbf16> to vector<32x64xbf16>
    %447 = arith.truncf %444 : vector<16x32xf32> to vector<16x32xbf16>
    %cst_166 = arith.constant dense<0.000000e+00> : vector<16x64xf32>
    %448 = tpu.matmul %447, %446, %cst_166 {dimension_numbers = #tpu.dot_dimension_numbers<[1], [0], [0], [1], [0, 0, 1, 1], [], []>} : vector<16x32xbf16>, vector<32x64xbf16>, vector<16x64xf32> -> vector<16x64xf32>
    %c1_167 = arith.constant 1 : index
    %c0_168 = arith.constant 0 : index
    %c0_169 = arith.constant 0 : index
    %449 = vector.load %arg10[%c1_167, %c0_168, %c0_169] : memref<2x1x64xf32, #tpu.memory_space<vmem>>, vector<1x1x64xf32>
    %450 = vector.shape_cast %449 : vector<1x1x64xf32> to vector<1x64xf32>
    %451 = vector.broadcast %450 : vector<1x64xf32> to vector<16x64xf32>
    %452 = arith.addf %448, %451 : vector<16x64xf32>
    %cst_170 = arith.constant 5.000000e-01 : f32
    %453 = vector.broadcast %cst_170 : f32 to vector<16x64xf32>
    %454 = arith.mulf %453, %452 : vector<16x64xf32>
    %cst_171 = arith.constant 0.707106769 : f32
    %455 = vector.broadcast %cst_171 : f32 to vector<16x64xf32>
    %456 = arith.mulf %452, %455 : vector<16x64xf32>
    %cst_172 = arith.constant 0.000000e+00 : f32
    %457 = vector.broadcast %cst_172 : f32 to vector<16x64xf32>
    %458 = arith.cmpf oge, %456, %457 : vector<16x64xf32>
    %cst_173 = arith.constant 1.000000e+00 : f32
    %cst_174 = arith.constant -1.000000e+00 : f32
    %459 = vector.broadcast %cst_173 : f32 to vector<16x64xf32>
    %460 = vector.broadcast %cst_174 : f32 to vector<16x64xf32>
    %461 = arith.select %458, %459, %460 : vector<16x64xi1>, vector<16x64xf32>
    %462 = math.absf %456 : vector<16x64xf32>
    %cst_175 = arith.constant 0.327591091 : f32
    %463 = vector.broadcast %cst_175 : f32 to vector<16x64xf32>
    %464 = arith.mulf %463, %462 : vector<16x64xf32>
    %cst_176 = arith.constant 1.000000e+00 : f32
    %465 = vector.broadcast %cst_176 : f32 to vector<16x64xf32>
    %466 = arith.addf %465, %464 : vector<16x64xf32>
    %cst_177 = arith.constant 1.000000e+00 : f32
    %467 = vector.broadcast %cst_177 : f32 to vector<16x64xf32>
    %468 = arith.divf %467, %466 : vector<16x64xf32>
    %cst_178 = arith.constant 1.06140542 : f32
    %469 = vector.broadcast %cst_178 : f32 to vector<16x64xf32>
    %470 = arith.mulf %469, %468 : vector<16x64xf32>
    %cst_179 = arith.constant -1.45315206 : f32
    %471 = vector.broadcast %cst_179 : f32 to vector<16x64xf32>
    %472 = arith.addf %470, %471 : vector<16x64xf32>
    %473 = arith.mulf %472, %468 : vector<16x64xf32>
    %cst_180 = arith.constant 1.42141378 : f32
    %474 = vector.broadcast %cst_180 : f32 to vector<16x64xf32>
    %475 = arith.addf %473, %474 : vector<16x64xf32>
    %476 = arith.mulf %475, %468 : vector<16x64xf32>
    %cst_181 = arith.constant -0.284496725 : f32
    %477 = vector.broadcast %cst_181 : f32 to vector<16x64xf32>
    %478 = arith.addf %476, %477 : vector<16x64xf32>
    %479 = arith.mulf %478, %468 : vector<16x64xf32>
    %cst_182 = arith.constant 0.254829586 : f32
    %480 = vector.broadcast %cst_182 : f32 to vector<16x64xf32>
    %481 = arith.addf %479, %480 : vector<16x64xf32>
    %482 = arith.mulf %481, %468 : vector<16x64xf32>
    %cst_183 = arith.constant 0.000000e+00 : f32
    %483 = vector.broadcast %cst_183 : f32 to vector<16x64xf32>
    %484 = arith.subf %483, %462 : vector<16x64xf32>
    %485 = arith.mulf %484, %462 : vector<16x64xf32>
    %486 = math.exp %485 : vector<16x64xf32>
    %487 = arith.mulf %482, %486 : vector<16x64xf32>
    %cst_184 = arith.constant 1.000000e+00 : f32
    %488 = vector.broadcast %cst_184 : f32 to vector<16x64xf32>
    %489 = arith.subf %488, %487 : vector<16x64xf32>
    %490 = arith.mulf %461, %489 : vector<16x64xf32>
    %cst_185 = arith.constant 1.000000e+00 : f32
    %491 = vector.broadcast %cst_185 : f32 to vector<16x64xf32>
    %492 = arith.addf %491, %490 : vector<16x64xf32>
    %493 = arith.mulf %454, %492 : vector<16x64xf32>
    %c1_186 = arith.constant 1 : index
    %c0_187 = arith.constant 0 : index
    %c0_188 = arith.constant 0 : index
    %494 = vector.load %arg11[%c1_186, %c0_187, %c0_188] : memref<2x64x32xbf16, #tpu.memory_space<vmem>>, vector<1x64x32xbf16>
    %495 = vector.shape_cast %494 : vector<1x64x32xbf16> to vector<64x32xbf16>
    %496 = arith.truncf %493 : vector<16x64xf32> to vector<16x64xbf16>
    %cst_189 = arith.constant dense<0.000000e+00> : vector<16x32xf32>
    %497 = tpu.matmul %496, %495, %cst_189 {dimension_numbers = #tpu.dot_dimension_numbers<[1], [0], [0], [1], [0, 0, 1, 1], [], []>} : vector<16x64xbf16>, vector<64x32xbf16>, vector<16x32xf32> -> vector<16x32xf32>
    %c1_190 = arith.constant 1 : index
    %c0_191 = arith.constant 0 : index
    %c0_192 = arith.constant 0 : index
    %498 = vector.load %arg12[%c1_190, %c0_191, %c0_192] : memref<2x1x32xf32, #tpu.memory_space<vmem>>, vector<1x1x32xf32>
    %499 = vector.shape_cast %498 : vector<1x1x32xf32> to vector<1x32xf32>
    %500 = vector.broadcast %499 : vector<1x32xf32> to vector<16x32xf32>
    %501 = arith.addf %497, %500 : vector<16x32xf32>
    %502 = arith.addf %444, %501 : vector<16x32xf32>
    %c1_193 = arith.constant 1 : index
    %c0_194 = arith.constant 0 : index
    %c0_195 = arith.constant 0 : index
    %503 = vector.load %arg13[%c1_193, %c0_194, %c0_195] : memref<2x1x32xf32, #tpu.memory_space<vmem>>, vector<1x1x32xf32>
    %504 = vector.shape_cast %503 : vector<1x1x32xf32> to vector<1x32xf32>
    %c1_196 = arith.constant 1 : index
    %c0_197 = arith.constant 0 : index
    %c0_198 = arith.constant 0 : index
    %505 = vector.load %arg14[%c1_196, %c0_197, %c0_198] : memref<2x1x32xf32, #tpu.memory_space<vmem>>, vector<1x1x32xf32>
    %506 = vector.shape_cast %505 : vector<1x1x32xf32> to vector<1x32xf32>
    %cst_199 = arith.constant dense<0.000000e+00> : vector<16xf32>
    %507 = vector.multi_reduction <add>, %502, %cst_199 [1] : vector<16x32xf32> to vector<16xf32>
    %508 = vector.shape_cast %507 : vector<16xf32> to vector<16x1xf32>
    %cst_200 = arith.constant 3.200000e+01 : f32
    %509 = vector.broadcast %cst_200 : f32 to vector<16x1xf32>
    %510 = arith.divf %508, %509 : vector<16x1xf32>
    %511 = vector.broadcast %510 : vector<16x1xf32> to vector<16x32xf32>
    %512 = arith.subf %502, %511 : vector<16x32xf32>
    %513 = arith.mulf %512, %512 : vector<16x32xf32>
    %cst_201 = arith.constant dense<0.000000e+00> : vector<16xf32>
    %514 = vector.multi_reduction <add>, %513, %cst_201 [1] : vector<16x32xf32> to vector<16xf32>
    %515 = vector.shape_cast %514 : vector<16xf32> to vector<16x1xf32>
    %cst_202 = arith.constant 3.200000e+01 : f32
    %516 = vector.broadcast %cst_202 : f32 to vector<16x1xf32>
    %517 = arith.divf %515, %516 : vector<16x1xf32>
    %cst_203 = arith.constant 9.99999996E-13 : f32
    %518 = vector.broadcast %cst_203 : f32 to vector<16x1xf32>
    %519 = arith.addf %517, %518 : vector<16x1xf32>
    %520 = math.rsqrt %519 : vector<16x1xf32>
    %521 = vector.broadcast %520 : vector<16x1xf32> to vector<16x32xf32>
    %522 = arith.mulf %512, %521 : vector<16x32xf32>
    %523 = vector.broadcast %504 : vector<1x32xf32> to vector<16x32xf32>
    %524 = arith.mulf %522, %523 : vector<16x32xf32>
    %525 = vector.broadcast %506 : vector<1x32xf32> to vector<16x32xf32>
    %526 = arith.addf %524, %525 : vector<16x32xf32>
    %527 = vector.extract_strided_slice %526 {offsets = [0, 0], sizes = [1, 32], strides = [1, 1]} : vector<16x32xf32> to vector<1x32xf32>
    %528 = vector.extract_strided_slice %526 {offsets = [8, 0], sizes = [1, 32], strides = [1, 1]} : vector<16x32xf32> to vector<1x32xf32>
    %529 = tpu.concatenate %527, %528, %527, %527, %527, %527, %527, %527 in 0 : vector<1x32xf32>, vector<1x32xf32>, vector<1x32xf32>, vector<1x32xf32>, vector<1x32xf32>, vector<1x32xf32>, vector<1x32xf32>, vector<1x32xf32> -> vector<8x32xf32>
    %c0_204 = arith.constant 0 : index
    %c0_205 = arith.constant 0 : index
    %530 = vector.load %arg15[%c0_204, %c0_205] : memref<32x32xbf16, #tpu.memory_space<vmem>>, vector<32x32xbf16>
    %531 = arith.truncf %529 : vector<8x32xf32> to vector<8x32xbf16>
    %cst_206 = arith.constant dense<0.000000e+00> : vector<8x32xf32>
    %532 = tpu.matmul %531, %530, %cst_206 {dimension_numbers = #tpu.dot_dimension_numbers<[1], [0], [0], [1], [0, 0, 1, 1], [], []>} : vector<8x32xbf16>, vector<32x32xbf16>, vector<8x32xf32> -> vector<8x32xf32>
    %c0_207 = arith.constant 0 : index
    %c0_208 = arith.constant 0 : index
    %533 = vector.load %arg16[%c0_207, %c0_208] : memref<1x32xf32, #tpu.memory_space<vmem>>, vector<1x32xf32>
    %534 = vector.broadcast %533 : vector<1x32xf32> to vector<8x32xf32>
    %535 = arith.addf %532, %534 : vector<8x32xf32>
    %536 = math.tanh %535 : vector<8x32xf32>
    %c0_209 = arith.constant 0 : index
    %c0_210 = arith.constant 0 : index
    %537 = vector.load %arg17[%c0_209, %c0_210] : memref<32x128xbf16, #tpu.memory_space<vmem>>, vector<32x128xbf16>
    %538 = arith.truncf %536 : vector<8x32xf32> to vector<8x32xbf16>
    %cst_211 = arith.constant dense<0.000000e+00> : vector<8x128xf32>
    %539 = tpu.matmul %538, %537, %cst_211 {dimension_numbers = #tpu.dot_dimension_numbers<[1], [0], [0], [1], [0, 0, 1, 1], [], []>} : vector<8x32xbf16>, vector<32x128xbf16>, vector<8x128xf32> -> vector<8x128xf32>
    %c0_212 = arith.constant 0 : index
    %c0_213 = arith.constant 0 : index
    %540 = vector.load %arg18[%c0_212, %c0_213] : memref<1x128xf32, #tpu.memory_space<vmem>>, vector<1x128xf32>
    %541 = vector.broadcast %540 : vector<1x128xf32> to vector<8x128xf32>
    %542 = arith.addf %539, %541 : vector<8x128xf32>
    %c0_214 = arith.constant 0 : index
    %c0_215 = arith.constant 0 : index
    %543 = vector.load %arg19[%c0_214, %c0_215] : memref<8x128xf32, #tpu.memory_space<vmem>>, vector<8x128xf32>
    tpu.vector_store %arg19[%c0_214, %c0_215], %542 {strides = array<i32>} : memref<8x128xf32, #tpu.memory_space<vmem>>, vector<8x128xf32>,
    return
  }
}

</mosaic_0001>

<bundles_post_ra>
// kernel: minilm_forward.1
= control target key start
LH: loop header
LB: loop body
LE: loop exit
PB: predicated region body
PF: predicated region fallthrough
CT: control target
= control target key end

     0   :  { %vm67_vm0 = vcmask 261120   ;;  %v4510_v14 = vmov 0.0   ;;  %vm4511_vm1 = vmmov 0   ;;  %s4512_s21 = smov 96   ;;  %s4514_s22 = smov 80   ;;  %vm182_vm2 = vcmask 64512   ;;  %s5195_s0 = inlined_call_operand.vmem [shape: f32[16,32], index: 0, kind: input, shape index: {}]   ;;  %s5196_s3 = inlined_call_operand.vmem [shape: bf16[2,32,96], index: 3, kind: input, shape index: {}]   ;;  %s5197_s1 = inlined_call_operand.vmem [shape: f32[1,32], index: 1, kind: input, shape index: {}]   ;;  %s5198_s2 = inlined_call_operand.vmem [shape: f32[1,32], index: 2, kind: input, shape index: {}]   ;;  %s5199_s4 = inlined_call_operand.vmem [shape: f32[2,1,96], index: 4, kind: input, shape index: {}]   ;;  %s5200_s5 = inlined_call_operand.vmem [shape: bf16[2,32,32], index: 5, kind: input, shape index: {}]   ;;  %s5201_s6 = inlined_call_operand.vmem [shape: f32[2,1,32], index: 6, kind: input, shape index: {}]   ;;  %s5202_s9 = inlined_call_operand.vmem [shape: bf16[2,32,64], index: 9, kind: input, shape index: {}]   ;;  %s5203_s7 = inlined_call_operand.vmem [shape: f32[2,1,32], index: 7, kind: input, shape index: {}]   ;;  %s5204_s8 = inlined_call_operand.vmem [shape: f32[2,1,32], index: 8, kind: input, shape index: {}]   ;;  %s5205_s11 = inlined_call_operand.vmem [shape: bf16[2,64,32], index: 11, kind: input, shape index: {}]   ;;  %s5206_s10 = inlined_call_operand.vmem [shape: f32[2,1,64], index: 10, kind: input, shape index: {}]   ;;  %s5207_s12 = inlined_call_operand.vmem [shape: f32[2,1,32], index: 12, kind: input, shape index: {}]   ;;  %s5208_s13 = inlined_call_operand.vmem [shape: f32[2,1,32], index: 13, kind: input, shape index: {}]   ;;  %s5209_s14 = inlined_call_operand.vmem [shape: f32[2,1,32], index: 14, kind: input, shape index: {}]   ;;  %s5210_s15 = inlined_call_operand.vmem [shape: bf16[32,32], index: 15, kind: input, shape index: {}]   ;;  %s5211_s17 = inlined_call_operand.vmem [shape: bf16[32,128], index: 17, kind: input, shape index: {}]   ;;  %s5212_s16 = inlined_call_operand.vmem [shape: f32[1,32], index: 16, kind: input, shape index: {}]   ;;  %s5213_s18 = inlined_call_operand.vmem [shape: f32[1,128], index: 18, kind: input, shape index: {}]   ;;  %s5214_s19 = inlined_call_operand.vmem [shape: f32[8,128], index: 19, kind: output, shape index: {}]  }
   0x1   :  { %5228 = sst [smem:[#allocation2_spill]] %s5195_s0  ;;  %4089 = vmatprep.subr.bf16.mxu0 %v4510_v14  ;;  %4093 = vmatprep.mubr.msk.bf16.mxu0 %vm4511_vm1, %v4510_v14  ;;  %v3863_v34 = vld [vmem:[%s5199_s4] ss:$0 sm:$0xff]  ;;  %s4516_s24 = smov 120   ;;  %vm852_vm3 = vcmask 130048   ;;  %vm854_vm4 = vcmask 195584  }
   0x2   :  { %5229 = sst [smem:[#allocation3_spill]] %s5196_s3  ;;  %4097 = vmatprep.subr.mxu1 %v4510_v14  ;;  %4099 = vmatprep.mubr.msk.f32.mxu1 %vm4511_vm1, %v4510_v14  ;;  %s4513_s3 = smov 88   ;;  %vm1806_vm7 = vcmask 523264   ;;  %vm3707_vm10 = vcmask 1040384   ;;  %vm3709_vm11 = vcmask 1041408   ;;  %vm3711_vm12 = vcmask 1042432  }
   0x3   :  { %5230 = sst [smem:[#allocation4_spill]] %s5197_s1  ;;  %s4515_s1 = smov 72   ;;  %vm3713_vm13 = vcmask 1043456   ;;  %vm3715_vm14 = vcmask 1044480   ;;  %vm3717_vm15 = vcmask 1045504  }
   0x4   :  { %5231 = sst [smem:[#allocation5_spill]] %s5198_s2  ;;  %s4517_s25 = smov 112  }
   0x5   :  { %s5232_s20 = sld [smem:[#allocation2_spill]]  ;;  %s4518_s2 = smov 104  }
   0x6   :  { %s5233_s23 = sld [smem:[#allocation3_spill]]  ;;  %s5219_s26 = smov 64  }
   0x7   :  { %s5234_s27 = sld [smem:[#allocation4_spill]]  ;;  %s5217_s28 = smov 40  }
   0x8   :  { %s5235_s0 = sld [smem:[#allocation5_spill]]  ;;  %s5224_s29 = smov 48  }
   0x9   :  { %s5240_s30 = smov 8  }
   0xb   :  { %v63_v0 = vld [vmem:[%s5232_s20] sm:$0xff]  ;;  %v64_v1 = vld [vmem:[%s5232_s20 + $0x8] sm:$0xff]  ;;  %s5241_s20 = smov 16  }
   0xc   :  { %v68_v2 = vsel %vm67_vm0, %v63_v0, 0.0  ;;  %v71_v3 = vsel %vm67_vm0, %v64_v1, 0.0  ;;  %v4384_v15 = vld [vmem:[%s5233_s23 + $0x8] sm:$0xff]   ;;  %v4385_v16 = vld [vmem:[%s5233_s23] sm:$0xff]  }
   0xd   :  { %69 = vadd.xlane.f32.xlu0 %v68_v2  ;;  %4090 = vmatpush3.bf16.msra.mxu0 %v4384_v15  ;;  %v3861_v25 = vld [vmem:[%s5234_s27] ss:$0 sm:$0xff]  ;;  %s5226_s27 = smov 56  }
   0xe   :  { %4091 = vmatprep.subr.bf16.mxu0 %v4510_v14  ;;  %v3862_v29 = vld [vmem:[%s5235_s0] ss:$0 sm:$0xff]  ;;  %s5222_s0 = smov 16  }
  0x11   :  { %72 = vadd.xlane.f32.xlu0 %v71_v3  ;;  %4092 = vmatpush3.bf16.msra.mxu0 %v4385_v16 }
  0x12   :  { %4112 = vmatprep.subr.mxu0 %v4510_v14 }
  0x96   :  { %v70_v4 = vpop.xlane.xlu0 %69 }
  0x97   :  { %v75_v5 = vmul.f32 0.03125, %v70_v4 }
  0x99   :  { %v77_v6 = vsub.f32 %v63_v0, %v75_v5 }
  0x9a   :  { %v73_v7 = vpop.xlane.xlu0 %72 }
  0x9b   :  { %v76_v8 = vmul.f32 0.03125, %v73_v7  ;;  %v79_v9 = vmul.f32 %v77_v6, %v77_v6 }
  0x9d   :  { %v78_v10 = vsub.f32 %v64_v1, %v76_v8  ;;  %v81_v11 = vsel %vm67_vm0, %v79_v9, 0.0 }
  0x9e   :  { %82 = vadd.xlane.f32.xlu1 %v81_v11 }
  0x9f   :  { %v80_v12 = vmul.f32 %v78_v10, %v78_v10 }
  0xa1   :  { %v84_v13 = vsel %vm67_vm0, %v80_v12, 0.0 }
  0xa2   :  { %85 = vadd.xlane.f32.xlu1 %v84_v13 }
 0x127   :  { %v83_v17 = vpop.xlane.xlu1 %82 }
 0x128   :  { %v87_v18 = vmul.f32 0.03125, %v83_v17 }
 0x12a   :  { %v89_v19 = vadd.f32 1e-12, %v87_v18 }
 0x12b   :  { %v86_v20 = vpop.xlane.xlu1 %85 }
 0x12c   :  { %4408 = vrsqrt.f32 %v89_v19  ;;  %v88_v21 = vmul.f32 0.03125, %v86_v20 }
 0x12e   :  { %v90_v22 = vadd.f32 1e-12, %v88_v21 }
 0x130   :  { %4410 = vrsqrt.f32 %v90_v22 }
 0x139   :  { %v4409_v23 = vpop.eup %4408 }
 0x13a   :  { %v93_v24 = vmul.f32 %v4409_v23, %v77_v6 }
 0x13c   :  { %v101_v28 = vmul.f32 %v3861_v25, %v93_v24 }
 0x13d   :  { %v4411_v26 = vpop.eup %4410 }
 0x13e   :  { %v94_v27 = vmul.f32 %v4411_v26, %v78_v10  ;;  %v4657_v31 = vadd.f32 %v3862_v29, %v101_v28 }
 0x140   :  { %v102_v30 = vmul.f32 %v3861_v25, %v94_v27 }
 0x142   :  { %v4659_v32 = vadd.f32 %v3862_v29, %v102_v30 }
 0x144   :  { %v115_v33 = vpack.c.bf16 %v4659_v32, %v4657_v31 }
 0x146   :  { %4094 = vmatmul.mubr.msk.bf16.vlgmr.msra.gmra.mxu0 %vm67_vm0, %v115_v33 }
 0x147   :  { %4114 = vmatprep.mubr.msk.f32.mxu0 %vm4511_vm1, %v4510_v14 }
 0x206   :  { %v172_v35 = vpop.f32.mrf.mxu0 }
 0x207   :  { %v4669_v36 = vadd.f32 %v3863_v34, %v172_v35 }
 0x208   :  { %v4095_v37 = vpop.f32.mrf.mxu0 }
 0x209   :  { %180 = vrot.lane.b32.xlu0 %v4669_v36, %s4512_s21 }
 0x20a   :  { %v175_v38 = vpop.f32.mrf.mxu0 }
 0x20b   :  { %v4679_v40 = vadd.f32 %v3863_v34, %v175_v38 }
 0x20c   :  { %v4096_v39 = vpop.f32.mrf.mxu0 }
 0x20d   :  { %346 = vrot.lane.b32.xlu0 %v4669_v36, %s4513_s3 }
 0x211   :  { %511 = vrot.lane.b32.xlu0 %v4669_v36, %s4514_s22 }
 0x215   :  { %676 = vrot.lane.b32.xlu0 %v4669_v36, %s4515_s1 }
 0x219   :  { %857 = vrot.lane.b32.xlu0 %v4679_v40, %s4512_s21 }
 0x21d   :  { %1020 = vrot.lane.b32.xlu0 %v4679_v40, %s4516_s24 }
 0x221   :  { %1185 = vrot.lane.b32.xlu0 %v4679_v40, %s4517_s25 }
 0x225   :  { %1350 = vrot.lane.b32.xlu0 %v4679_v40, %s4518_s2 }
 0x27b   :  { %v181_v41 = vpop.permute.xlu0 %180 }
 0x27c   :  { %4098 = vmatpush3.xpose.msk.msra.mxu1 %vm182_vm2, %v181_v41 }
 0x27d   :  { %4102 = vmatprep.subr.mxu1 %v4510_v14 }
 0x27f   :  { %4100 = vmatmul.mubr.msk.f32.vlgmr.msra.gmra.mxu1 %vm182_vm2, %v4669_v36  ;;  %v347_v53 = vpop.permute.xlu0 %346 }
 0x280   :  { %4104 = vmatprep.mubr.msk.f32.mxu1 %vm4511_vm1, %v4510_v14 }
 0x283   :  { %v512_v55 = vpop.permute.xlu0 %511 }
 0x287   :  { %v677_v58 = vpop.permute.xlu0 %676 }
 0x28b   :  { %v858_v60 = vpop.permute.xlu0 %857 }
 0x28f   :  { %v1021_v62 = vpop.permute.xlu0 %1020 }
 0x293   :  { %v1186_v0 = vpop.permute.xlu0 %1185 }
 0x297   :  { %v1351_v2 = vpop.permute.xlu0 %1350 }
 0x33f   :  { %v253_v42 = vpop.f32.mrf.mxu1 }
 0x340   :  { %v257_v43 = vsel %vm182_vm2, %v253_v42, -inf }
 0x341   :  { %258 = vmax.xlane.f32.xlu1 %v257_v43  ;;  %v4101_v44 = vpop.f32.mrf.mxu1 }
 0x352   :  { %268 = vrot.lane.b32.xlu1 %v4669_v36, %s5219_s26 }
 0x356   :  { %344 = vrot.lane.b32.xlu1 %v4669_v36, %s4516_s24 }
 0x3ca   :  { %v259_v45 = vpop.xlane.xlu1 %258 }
 0x3cb   :  { %v260_v46 = vsub.f32 %v253_v42, %v259_v45 }
 0x3cd   :  { %v261_v47 = vmul.f32 1.442695, %v260_v46 }
 0x3ce   :  { %v269_v48 = vpop.permute.xlu1 %268 }
 0x3cf   :  { %4412 = vpow2.f32 %v261_v47  ;;  %4103 = vmatpush3.msra.mxu1 %v269_v48 }
 0x3d0   :  { %4107 = vmatprep.subr.mxu1 %v4510_v14 }
 0x3d2   :  { %v345_v51 = vpop.permute.xlu1 %344 }
 0x3dc   :  { %v4413_v49 = vpop.eup %4412 }
 0x3dd   :  { %v263_v50 = vsel %vm182_vm2, %v4413_v49, 0.0 }
 0x3de   :  { %264 = vadd.xlane.f32.xlu1 %v263_v50 }
 0x3ef   :  { %509 = vrot.lane.b32.xlu1 %v4669_v36, %s4517_s25 }
 0x3f3   :  { %674 = vrot.lane.b32.xlu1 %v4669_v36, %s4518_s2 }
 0x3f7   :  { %1022 = vrot.lane.b32.xlu1 %v4679_v40, %s4513_s3 }
 0x3fb   :  { %1187 = vrot.lane.b32.xlu1 %v4679_v40, %s4514_s22 }
 0x3ff   :  { %1352 = vrot.lane.b32.xlu1 %v4679_v40, %s4515_s1 }
 0x467   :  { %v265_v52 = vpop.xlane.xlu1 %264 }
 0x468   :  { %4414 = vrcp.f32 %v265_v52 }
 0x46b   :  { %v510_v57 = vpop.permute.xlu1 %509 }
 0x46f   :  { %v675_v59 = vpop.permute.xlu1 %674 }
 0x473   :  { %v1023_v61 = vpop.permute.xlu1 %1022 }
 0x475   :  { %v4415_v54 = vpop.eup %4414 }
 0x476   :  { %v267_v56 = vmul.f32 %v4415_v54, %v4413_v49 }
 0x477   :  { %v1188_v63 = vpop.permute.xlu1 %1187 }
 0x478   :  { %4105 = vmatmul.mubr.msk.f32.vlgmr.msra.gmra.mxu1 %vm182_vm2, %v267_v56 }
 0x479   :  { %4108 = vmatpush3.xpose.msk.msra.mxu1 %vm182_vm2, %v347_v53  ;;  %4109 = vmatprep.mubr.msk.f32.mxu1 %vm4511_vm1, %v4510_v14 }
 0x47a   :  { %4117 = vmatprep.subr.mxu1 %v4510_v14 }
 0x47b   :  { %v1353_v1 = vpop.permute.xlu1 %1352 }
 0x47c   :  { %4110 = vmatmul.mubr.msk.f32.vlgmr.msra.gmra.mxu1 %vm182_vm2, %v345_v51 }
 0x47d   :  { %4118 = vmatpush3.xpose.msk.msra.mxu1 %vm182_vm2, %v512_v55  ;;  %4119 = vmatprep.mubr.msk.f32.mxu1 %vm4511_vm1, %v4510_v14 }
 0x47e   :  { %4127 = vmatprep.subr.mxu1 %v4510_v14 }
 0x480   :  { %4120 = vmatmul.mubr.msk.f32.vlgmr.msra.gmra.mxu1 %vm182_vm2, %v510_v57 }
 0x481   :  { %4128 = vmatpush3.xpose.msk.msra.mxu1 %vm182_vm2, %v677_v58  ;;  %4129 = vmatprep.mubr.msk.f32.mxu1 %vm4511_vm1, %v4510_v14 }
 0x482   :  { %4137 = vmatprep.subr.mxu1 %v4510_v14 }
 0x484   :  { %4130 = vmatmul.mubr.msk.f32.vlgmr.msra.gmra.mxu1 %vm182_vm2, %v675_v59 }
 0x485   :  { %4138 = vmatpush3.xpose.msk.msra.mxu1 %vm182_vm2, %v858_v60  ;;  %4139 = vmatprep.mubr.msk.f32.mxu1 %vm4511_vm1, %v4510_v14 }
 0x486   :  { %4147 = vmatprep.subr.mxu1 %v4510_v14 }
 0x488   :  { %4140 = vmatmul.mubr.msk.f32.vlgmr.msra.gmra.mxu1 %vm182_vm2, %v4679_v40 }
 0x489   :  { %4148 = vmatpush3.xpose.msk.msra.mxu1 %vm182_vm2, %v1023_v61  ;;  %4149 = vmatprep.mubr.msk.f32.mxu1 %vm4511_vm1, %v4510_v14 }
 0x48a   :  { %4157 = vmatprep.subr.mxu1 %v4510_v14 }
 0x48c   :  { %4150 = vmatmul.mubr.msk.f32.vlgmr.msra.gmra.mxu1 %vm182_vm2, %v1021_v62 }
 0x48d   :  { %4158 = vmatpush3.xpose.msk.msra.mxu1 %vm182_vm2, %v1188_v63  ;;  %4159 = vmatprep.mubr.msk.f32.mxu1 %vm4511_vm1, %v4510_v14 }
 0x48e   :  { %4167 = vmatprep.subr.mxu1 %v4510_v14 }
 0x490   :  { %4160 = vmatmul.mubr.msk.f32.vlgmr.msra.gmra.mxu1 %vm182_vm2, %v1186_v0 }
 0x491   :  { %4168 = vmatpush3.xpose.msk.msra.mxu1 %vm182_vm2, %v1353_v1  ;;  %4169 = vmatprep.mubr.msk.f32.mxu1 %vm4511_vm1, %v4510_v14 }
 0x492   :  { %4177 = vmatprep.subr.bf16.mxu1 %v4510_v14 }
 0x494   :  { %4170 = vmatmul.mubr.msk.f32.vlgmr.msra.gmra.mxu1 %vm182_vm2, %v1351_v2 }
 0x495   :  { %4181 = vmatprep.mubr.msk.bf16.mxu1 %vm4511_vm1, %v4510_v14 }
 0x538   :  { %v4751_v3 = vpop.f32.mrf.mxu1 }
 0x53a   :  { %v4106_v4 = vpop.f32.mrf.mxu1 }
 0x53c   :  { %v418_v5 = vpop.f32.mrf.mxu1 }
 0x53d   :  { %v422_v6 = vsel %vm182_vm2, %v418_v5, -inf }
 0x53e   :  { %v4111_v7 = vpop.f32.mrf.mxu1  ;;  %423 = vmax.xlane.f32.xlu1 %v422_v6 }
 0x540   :  { %v583_v8 = vpop.f32.mrf.mxu1 }
 0x541   :  { %v587_v9 = vsel %vm182_vm2, %v583_v8, -inf }
 0x542   :  { %v4121_v10 = vpop.f32.mrf.mxu1  ;;  %588 = vmax.xlane.f32.xlu0 %v587_v9 }
 0x544   :  { %v748_v11 = vpop.f32.mrf.mxu1 }
 0x545   :  { %v752_v12 = vsel %vm182_vm2, %v748_v11, -inf }
 0x546   :  { %v4131_v13 = vpop.f32.mrf.mxu1  ;;  %753 = vmax.xlane.f32.xlu0 %v752_v12 }
 0x548   :  { %v929_v15 = vpop.f32.mrf.mxu1 }
 0x549   :  { %v933_v16 = vsel %vm182_vm2, %v929_v15, -inf }
 0x54a   :  { %934 = vmax.xlane.f32.xlu0 %v933_v16  ;;  %v4141_v17 = vpop.f32.mrf.mxu1 }
 0x54c   :  { %v1094_v18 = vpop.f32.mrf.mxu1 }
 0x54d   :  { %v1098_v19 = vsel %vm182_vm2, %v1094_v18, -inf }
 0x54e   :  { %1099 = vmax.xlane.f32.xlu1 %v1098_v19  ;;  %v4151_v20 = vpop.f32.mrf.mxu1 }
 0x550   :  { %v1259_v21 = vpop.f32.mrf.mxu1 }
 0x551   :  { %v1263_v22 = vsel %vm182_vm2, %v1259_v21, -inf }
 0x552   :  { %1264 = vmax.xlane.f32.xlu0 %v1263_v22  ;;  %v4161_v23 = vpop.f32.mrf.mxu1 }
 0x554   :  { %v1424_v24 = vpop.f32.mrf.mxu1 }
 0x555   :  { %v1428_v26 = vsel %vm182_vm2, %v1424_v24, -inf }
 0x556   :  { %v4171_v25 = vpop.f32.mrf.mxu1 }
 0x55f   :  { %433 = vrot.lane.b32.xlu1 %v4669_v36, %s5226_s27 }
 0x583   :  { %1429 = vmax.xlane.f32.xlu1 %v1428_v26 }
 0x594   :  { %763 = vrot.lane.b32.xlu1 %v4669_v36, %s5217_s28 }
 0x598   :  { %944 = vrot.lane.b32.xlu1 %v4679_v40, %s5219_s26  ;;  %s5223_s26 = smov 8  }
 0x5c7   :  { %v424_v27 = vpop.xlane.xlu1 %423 }
 0x5c8   :  { %v425_v28 = vsub.f32 %v418_v5, %v424_v27 }
 0x5ca   :  { %v426_v29 = vmul.f32 1.442695, %v425_v28 }
 0x5cb   :  { %v589_v30 = vpop.xlane.xlu0 %588 }
 0x5cc   :  { %4416 = vpow2.f32 %v426_v29  ;;  %v590_v33 = vsub.f32 %v583_v8, %v589_v30 }
 0x5ce   :  { %v591_v34 = vmul.f32 1.442695, %v590_v33 }
 0x5cf   :  { %v754_v43 = vpop.xlane.xlu0 %753 }
 0x5d0   :  { %4418 = vpow2.f32 %v591_v34  ;;  %v755_v44 = vsub.f32 %v748_v11, %v754_v43  ;;  %v4387_v43 = vld [vmem:[%s5200_s5] sm:$0xff]  }
 0x5d2   :  { %v756_v47 = vmul.f32 1.442695, %v755_v44 }
 0x5d3   :  { %v935_v45 = vpop.xlane.xlu0 %934 }
 0x5d4   :  { %v936_v46 = vsub.f32 %v929_v15, %v935_v45  ;;  %4420 = vpow2.f32 %v756_v47 }
 0x5d6   :  { %v937_v50 = vmul.f32 1.442695, %v936_v46 }
 0x5d7   :  { %v1100_v35 = vpop.xlane.xlu1 %1099 }
 0x5d8   :  { %v1101_v48 = vsub.f32 %v1094_v18, %v1100_v35  ;;  %4422 = vpow2.f32 %v937_v50 }
 0x5d9   :  { %v4417_v37 = vpop.eup %4416 }
 0x5da   :  { %v428_v38 = vsel %vm182_vm2, %v4417_v37, 0.0  ;;  %v1102_v51 = vmul.f32 1.442695, %v1101_v48 }
 0x5db   :  { %v434_v39 = vpop.permute.xlu1 %433  ;;  %429 = vadd.xlane.f32.xlu0 %v428_v38  ;;  %v1265_v49 = vpop.xlane.xlu0 %1264 }
 0x5dc   :  { %4113 = vmatpush3.msra.mxu0 %v434_v39  ;;  %v1266_v52 = vsub.f32 %v1259_v21, %v1265_v49  ;;  %4424 = vpow2.f32 %v1102_v51  ;;  %v4386_v39 = vld [vmem:[%s5200_s5 + $0x8] sm:$0xff]  }
 0x5dd   :  { %v4419_v41 = vpop.eup %4418  ;;  %4122 = vmatprep.subr.mxu0 %v4510_v14  ;;  %4178 = vmatpush3.bf16.msra.mxu1 %v4386_v39 }
 0x5de   :  { %v593_v42 = vsel %vm182_vm2, %v4419_v41, 0.0  ;;  %v1267_v53 = vmul.f32 1.442695, %v1266_v52  ;;  %4179 = vmatprep.subr.bf16.mxu1 %v4510_v14 }
 0x5df   :  { %594 = vadd.xlane.f32.xlu1 %v593_v42 }
 0x5e0   :  { %4426 = vpow2.f32 %v1267_v53 }
 0x5e1   :  { %v4421_v54 = vpop.eup %4420  ;;  %4180 = vmatpush3.bf16.msra.mxu1 %v4387_v43 }
 0x5e2   :  { %4193 = vmatprep.subr.bf16.mxu1 %v4510_v14 }
 0x5e5   :  { %v4423_v57 = vpop.eup %4422 }
 0x5e6   :  { %v939_v61 = vsel %vm182_vm2, %v4423_v57, 0.0 }
 0x5e9   :  { %v4425_v59 = vpop.eup %4424 }
 0x5ea   :  { %v1104_v60 = vsel %vm182_vm2, %v4425_v59, 0.0 }
 0x5ed   :  { %v4427_v62 = vpop.eup %4426 }
 0x5ee   :  { %v1269_v63 = vsel %vm182_vm2, %v4427_v62, 0.0 }
 0x5f0   :  { %1109 = vrot.lane.b32.xlu1 %v4679_v40, %s5226_s27 }
 0x5f1   :  { %598 = vrot.lane.b32.xlu0 %v4669_v36, %s5224_s29  ;;  %v758_v36 = vsel %vm182_vm2, %v4421_v54, 0.0 }
 0x60c   :  { %v1430_v55 = vpop.xlane.xlu1 %1429 }
 0x60d   :  { %v1431_v56 = vsub.f32 %v1424_v24, %v1430_v55 }
 0x60f   :  { %v1432_v58 = vmul.f32 1.442695, %v1431_v56 }
 0x610   :  { %759 = vadd.xlane.f32.xlu0 %v758_v36  ;;  %v764_v2 = vpop.permute.xlu1 %763 }
 0x611   :  { %4428 = vpow2.f32 %v1432_v58 }
 0x614   :  { %1105 = vadd.xlane.f32.xlu0 %v1104_v60  ;;  %940 = vadd.xlane.f32.xlu1 %v939_v61  ;;  %v945_v4 = vpop.permute.xlu1 %944 }
 0x618   :  { %1270 = vadd.xlane.f32.xlu1 %v1269_v63 }
 0x61e   :  { %v4429_v0 = vpop.eup %4428 }
 0x61f   :  { %v1434_v1 = vsel %vm182_vm2, %v4429_v0, 0.0 }
 0x620   :  { %1435 = vadd.xlane.f32.xlu0 %v1434_v1 }
 0x629   :  { %1439 = vrot.lane.b32.xlu1 %v4679_v40, %s5217_s28  ;;  %s5221_s28 = smov 24  }
 0x636   :  { %1274 = vrot.lane.b32.xlu0 %v4679_v40, %s5224_s29 }
 0x664   :  { %v430_v5 = vpop.xlane.xlu0 %429 }
 0x665   :  { %4430 = vrcp.f32 %v430_v5 }
 0x668   :  { %v595_v6 = vpop.xlane.xlu1 %594  ;;  %v599_v9 = vpop.permute.xlu0 %598 }
 0x669   :  { %4432 = vrcp.f32 %v595_v6 }
 0x66c   :  { %v1110_v40 = vpop.permute.xlu1 %1109 }
 0x672   :  { %v4431_v7 = vpop.eup %4430 }
 0x673   :  { %v432_v8 = vmul.f32 %v4431_v7, %v4417_v37 }
 0x675   :  { %4115 = vmatmul.mubr.msk.f32.vlgmr.msra.gmra.mxu0 %vm182_vm2, %v432_v8 }
 0x676   :  { %v4433_v10 = vpop.eup %4432  ;;  %4123 = vmatpush3.msra.mxu0 %v599_v9  ;;  %4124 = vmatprep.mubr.msk.f32.mxu0 %vm4511_vm1, %v4510_v14 }
 0x677   :  { %4132 = vmatprep.subr.mxu0 %v4510_v14  ;;  %v597_v11 = vmul.f32 %v4433_v10, %v4419_v41 }
 0x679   :  { %4125 = vmatmul.mubr.msk.f32.vlgmr.msra.gmra.mxu0 %vm182_vm2, %v597_v11 }
 0x67a   :  { %4133 = vmatpush3.msra.mxu0 %v764_v2  ;;  %4134 = vmatprep.mubr.msk.f32.mxu0 %vm4511_vm1, %v4510_v14 }
 0x67b   :  { %4142 = vmatprep.subr.mxu0 %v4510_v14 }
 0x699   :  { %v760_v12 = vpop.xlane.xlu0 %759 }
 0x69a   :  { %4434 = vrcp.f32 %v760_v12 }
 0x69d   :  { %v941_v13 = vpop.xlane.xlu1 %940  ;;  %v1106_v15 = vpop.xlane.xlu0 %1105 }
 0x69e   :  { %4436 = vrcp.f32 %v941_v13 }
 0x69f   :  { %4438 = vrcp.f32 %v1106_v15 }
 0x6a1   :  { %v1271_v16 = vpop.xlane.xlu1 %1270 }
 0x6a2   :  { %4440 = vrcp.f32 %v1271_v16 }
 0x6a5   :  { %v1440_v27 = vpop.permute.xlu1 %1439 }
 0x6a7   :  { %v4435_v17 = vpop.eup %4434 }
 0x6a8   :  { %v762_v18 = vmul.f32 %v4435_v17, %v4421_v54 }
 0x6a9   :  { %v1436_v19 = vpop.xlane.xlu0 %1435 }
 0x6aa   :  { %4442 = vrcp.f32 %v1436_v19  ;;  %4135 = vmatmul.mubr.msk.f32.vlgmr.msra.gmra.mxu0 %vm182_vm2, %v762_v18 }
 0x6ab   :  { %v4437_v20 = vpop.eup %4436  ;;  %4143 = vmatpush3.msra.mxu0 %v945_v4  ;;  %4144 = vmatprep.mubr.msk.f32.mxu0 %vm4511_vm1, %v4510_v14 }
 0x6ac   :  { %4152 = vmatprep.subr.mxu0 %v4510_v14  ;;  %v943_v21 = vmul.f32 %v4437_v20, %v4423_v57  ;;  %v4439_v22 = vpop.eup %4438 }
 0x6ad   :  { %v1108_v23 = vmul.f32 %v4439_v22, %v4425_v59  ;;  %v1275_v25 = vpop.permute.xlu0 %1274 }
 0x6ae   :  { %4145 = vmatmul.mubr.msk.f32.vlgmr.msra.gmra.mxu0 %vm182_vm2, %v943_v21 }
 0x6af   :  { %4153 = vmatpush3.msra.mxu0 %v1110_v40  ;;  %4154 = vmatprep.mubr.msk.f32.mxu0 %vm4511_vm1, %v4510_v14  ;;  %v4441_v24 = vpop.eup %4440 }
 0x6b0   :  { %4162 = vmatprep.subr.mxu0 %v4510_v14  ;;  %v1273_v26 = vmul.f32 %v4441_v24, %v4427_v62  ;;  %v4389_v24 = vld [vmem:[%s5202_s9] sm:$0xff]  }
 0x6b2   :  { %4155 = vmatmul.mubr.msk.f32.vlgmr.msra.gmra.mxu0 %vm182_vm2, %v1108_v23 }
 0x6b3   :  { %4163 = vmatpush3.msra.mxu0 %v1275_v25  ;;  %4164 = vmatprep.mubr.msk.f32.mxu0 %vm4511_vm1, %v4510_v14 }
 0x6b4   :  { %4172 = vmatprep.subr.mxu0 %v4510_v14 }
 0x6b6   :  { %4165 = vmatmul.mubr.msk.f32.vlgmr.msra.gmra.mxu0 %vm182_vm2, %v1273_v26 }
 0x6b7   :  { %v4443_v28 = vpop.eup %4442  ;;  %4173 = vmatpush3.msra.mxu0 %v1440_v27  ;;  %4174 = vmatprep.mubr.msk.f32.mxu0 %vm4511_vm1, %v4510_v14 }
 0x6b8   :  { %v1438_v29 = vmul.f32 %v4443_v28, %v4429_v0  ;;  %4185 = vmatprep.subr.bf16.mxu0 %v4510_v14 }
 0x6ba   :  { %4175 = vmatmul.mubr.msk.f32.vlgmr.msra.gmra.mxu0 %vm182_vm2, %v1438_v29 }
 0x6bb   :  { %4189 = vmatprep.mubr.msk.bf16.mxu0 %vm4511_vm1, %v4510_v14 }
 0x735   :  { %v505_v30 = vpop.f32.mrf.mxu0 }
 0x737   :  { %v4116_v33 = vpop.f32.mrf.mxu0 }
 0x739   :  { %v670_v34 = vpop.f32.mrf.mxu0 }
 0x73b   :  { %v4126_v35 = vpop.f32.mrf.mxu0 }
 0x73c   :  { %v3895_v35 = vld [vmem:[%s5203_s7] ss:$0 sm:$0xff] }
 0x76a   :  { %v835_v37 = vpop.f32.mrf.mxu0 }
 0x76c   :  { %v4136_v38 = vpop.f32.mrf.mxu0 }
 0x76e   :  { %v1016_v41 = vpop.f32.mrf.mxu0 }
 0x770   :  { %v4146_v42 = vpop.f32.mrf.mxu0 }
 0x772   :  { %v1181_v44 = vpop.f32.mrf.mxu0 }
 0x773   :  { %v4354_v45 = vpack.i.bf16 %v1181_v44, %v505_v30 }
 0x774   :  { %v4156_v46 = vpop.f32.mrf.mxu0 }
 0x775   :  { %4355 = vrot.lane.b32.xlu0 %v4354_v45, %s5223_s26  ;;  %v4390_v46 = vld [vmem:[%s5205_s11 + $0x18] sm:$0xff]  }
 0x776   :  { %v1346_v47 = vpop.f32.mrf.mxu0 }
 0x777   :  { %v4359_v48 = vpack.i.bf16 %v1346_v47, %v670_v34  ;;  %v4391_v47 = vld [vmem:[%s5205_s11 + $0x10] sm:$0xff]  }
 0x778   :  { %v4166_v49 = vpop.f32.mrf.mxu0 }
 0x779   :  { %4360 = vrot.lane.b32.xlu1 %v4359_v48, %s5222_s0  ;;  %v4392_v48 = vld [vmem:[%s5205_s11 + $0x8] sm:$0xff]   ;;  %v4393_v49 = vld [vmem:[%s5205_s11] sm:$0xff]   ;;  %s5242_s0 = smov 24  }
 0x77a   :  { %v1511_v50 = vpop.f32.mrf.mxu0 }
 0x77b   :  { %v4364_v51 = vpack.i.bf16 %v1511_v50, %v835_v37  ;;  %v3897_v50 = vld [vmem:[%s5206_s10] ss:$0 sm:$0xff] }
 0x77c   :  { %v4176_v52 = vpop.f32.mrf.mxu0 }
 0x77d   :  { %4365 = vrot.lane.b32.xlu0 %v4364_v51, %s5221_s28 }
 0x7e7   :  { %v4356_v53 = vpop.permute.xlu0 %4355 }
 0x7e8   :  { %v4358_v55 = vunpack.i.h.bf16 %v4356_v53  ;;  %v4357_v56 = vunpack.i.l.bf16 %v4356_v53 }
 0x7ea   :  { %v1527_v59 = vsel %vm182_vm2, %v1016_v41, %v4358_v55  ;;  %v851_v60 = vsel %vm182_vm2, %v4751_v3, %v4357_v56  ;;  %v3891_v3 = vld [vmem:[%s5201_s6] ss:$0 sm:$0xff] }
 0x7eb   :  { %v4361_v54 = vpop.permute.xlu1 %4360  ;;  %v3896_v41 = vld [vmem:[%s5204_s8] ss:$0 sm:$0xff] }
 0x7ec   :  { %v4363_v57 = vunpack.i.h.bf16 %v4361_v54  ;;  %v4362_v58 = vunpack.i.l.bf16 %v4361_v54 }
 0x7ee   :  { %v1528_v63 = vsel %vm852_vm3, %v1527_v59, %v4363_v57  ;;  %v853_v0 = vsel %vm852_vm3, %v851_v60, %v4362_v58 }
 0x7ef   :  { %v4366_v36 = vpop.permute.xlu0 %4365 }
 0x7f0   :  { %v4368_v61 = vunpack.i.h.bf16 %v4366_v36  ;;  %v4367_v62 = vunpack.i.l.bf16 %v4366_v36 }
 0x7f2   :  { %v1529_v1 = vsel %vm854_vm4, %v1528_v63, %v4368_v61  ;;  %v855_v2 = vsel %vm854_vm4, %v853_v0, %v4367_v62 }
 0x7f3   :  { %v1534_v4 = vpack.c.bf16 %v1529_v1, %v855_v2 }
 0x7f5   :  { %4182 = vmatmul.mubr.msk.bf16.vlgmr.msra.gmra.mxu1 %vm67_vm0, %v1534_v4 }
 0x7f6   :  { %4201 = vmatprep.mubr.msk.bf16.mxu1 %vm4511_vm1, %v4510_v14  ;;  %4194 = vmatpush3.bf16.msra.mxu1 %v4390_v46 }
 0x7f7   :  { %4195 = vmatprep.subr.bf16.mxu1 %v4510_v14 }
 0x7fa   :  { %4196 = vmatpush3.bf16.msra.mxu1 %v4391_v47 }
 0x7fb   :  { %4197 = vmatprep.subr.bf16.mxu1 %v4510_v14 }
 0x7fe   :  { %4198 = vmatpush3.bf16.msra.mxu1 %v4392_v48  ;;  %v3901_v48 = vld [vmem:[%s5207_s12] ss:$0 sm:$0xff] }
 0x7ff   :  { %4199 = vmatprep.subr.bf16.mxu1 %v4510_v14 }
 0x802   :  { %4200 = vmatpush3.bf16.msra.mxu1 %v4393_v49 }
 0x803   :  { %4223 = vmatprep.subr.mxu1 %v4510_v14 }
 0x8b5   :  { %v1591_v5 = vpop.f32.mrf.mxu1 }
 0x8b6   :  { %v1592_v6 = vadd.f32 %v3891_v3, %v1591_v5 }
 0x8b7   :  { %v4183_v7 = vpop.f32.mrf.mxu1 }
 0x8b8   :  { %v1598_v8 = vadd.f32 %v1592_v6, %v4657_v31 }
 0x8b9   :  { %v1594_v9 = vpop.f32.mrf.mxu1 }
 0x8ba   :  { %v1595_v10 = vadd.f32 %v3891_v3, %v1594_v9  ;;  %v1602_v11 = vsel %vm67_vm0, %v1598_v8, 0.0 }
 0x8bb   :  { %1603 = vadd.xlane.f32.xlu1 %v1602_v11  ;;  %v4184_v40 = vpop.f32.mrf.mxu1 }
 0x8bc   :  { %v1599_v12 = vadd.f32 %v1595_v10, %v4659_v32  ;;  %v4388_v32 = vld [vmem:[%s5202_s9 + $0x8] sm:$0xff]  }
 0x8bd   :  { %4186 = vmatpush3.bf16.msra.mxu0 %v4388_v32 }
 0x8be   :  { %v1605_v13 = vsel %vm67_vm0, %v1599_v12, 0.0  ;;  %4187 = vmatprep.subr.bf16.mxu0 %v4510_v14 }
 0x8bf   :  { %1606 = vadd.xlane.f32.xlu0 %v1605_v13 }
 0x8c1   :  { %4188 = vmatpush3.bf16.msra.mxu0 %v4389_v24 }
 0x8c2   :  { %4205 = vmatprep.subr.bf16.mxu0 %v4510_v14 }
 0x944   :  { %v1604_v15 = vpop.xlane.xlu1 %1603 }
 0x945   :  { %v1608_v16 = vmul.f32 0.03125, %v1604_v15 }
 0x947   :  { %v1610_v17 = vsub.f32 %v1598_v8, %v1608_v16 }
 0x948   :  { %v1607_v18 = vpop.xlane.xlu0 %1606 }
 0x949   :  { %v1609_v19 = vmul.f32 0.03125, %v1607_v18  ;;  %v1612_v20 = vmul.f32 %v1610_v17, %v1610_v17 }
 0x94b   :  { %v1611_v21 = vsub.f32 %v1599_v12, %v1609_v19  ;;  %v1614_v31 = vsel %vm67_vm0, %v1612_v20, 0.0 }
 0x94c   :  { %1615 = vadd.xlane.f32.xlu0 %v1614_v31 }
 0x94d   :  { %v1613_v22 = vmul.f32 %v1611_v21, %v1611_v21 }
 0x94f   :  { %v1617_v23 = vsel %vm67_vm0, %v1613_v22, 0.0 }
 0x950   :  { %1618 = vadd.xlane.f32.xlu0 %v1617_v23 }
 0x9d5   :  { %v1616_v25 = vpop.xlane.xlu0 %1615 }
 0x9d6   :  { %v1620_v26 = vmul.f32 0.03125, %v1616_v25 }
 0x9d8   :  { %v1622_v27 = vadd.f32 1e-12, %v1620_v26 }
 0x9d9   :  { %v1619_v28 = vpop.xlane.xlu0 %1618 }
 0x9da   :  { %4444 = vrsqrt.f32 %v1622_v27  ;;  %v1621_v29 = vmul.f32 0.03125, %v1619_v28  ;;  %v4526_v28 = vmov -1.0  }
 0x9dc   :  { %v1623_v30 = vadd.f32 1e-12, %v1621_v29 }
 0x9de   :  { %4446 = vrsqrt.f32 %v1623_v30 }
 0x9e7   :  { %v4445_v33 = vpop.eup %4444 }
 0x9e8   :  { %v1626_v34 = vmul.f32 %v4445_v33, %v1610_v17 }
 0x9ea   :  { %v1634_v39 = vmul.f32 %v3895_v35, %v1626_v34 }
 0x9eb   :  { %v4447_v37 = vpop.eup %4446 }
 0x9ec   :  { %v1627_v38 = vmul.f32 %v4447_v37, %v1611_v21  ;;  %v4853_v43 = vadd.f32 %v3896_v41, %v1634_v39 }
 0x9ee   :  { %v1635_v42 = vmul.f32 %v3895_v35, %v1627_v38 }
 0x9f0   :  { %v4855_v44 = vadd.f32 %v3896_v41, %v1635_v42 }
 0x9f2   :  { %v1648_v45 = vpack.c.bf16 %v4855_v44, %v4853_v43 }
 0x9f4   :  { %4190 = vmatmul.mubr.msk.bf16.vlgmr.msra.gmra.mxu0 %vm67_vm0, %v1648_v45 }
 0x9f5   :  { %4209 = vmatprep.mubr.msk.bf16.mxu0 %vm4511_vm1, %v4510_v14 }
 0xab4   :  { %v1705_v51 = vpop.f32.mrf.mxu0 }
 0xab5   :  { %v1706_v52 = vadd.f32 %v3897_v50, %v1705_v51 }
 0xab6   :  { %v4191_v53 = vpop.f32.mrf.mxu0 }
 0xab7   :  { %v1714_v54 = vmul.f32 0.70710677, %v1706_v52  ;;  %v1712_v39 = vmul.f32 0.5, %v1706_v52 }
 0xab8   :  { %v1708_v55 = vpop.f32.mrf.mxu0 }
 0xab9   :  { %v1720_v56 = vand.u32 2147483647, %v1714_v54  ;;  %v1709_v57 = vadd.f32 %v3897_v50, %v1708_v55  ;;  %vm1716_vm5 = vcmp.ge.f32.partialorder %v1714_v54, 0.0 }
 0xaba   :  { %v4192_v58 = vpop.f32.mrf.mxu0  ;;  %v1718_v29 = vsel %vm1716_vm5, 1.0, %v4526_v28 }
 0xabb   :  { %v1722_v36 = vmul.f32 0.3275911, %v1720_v56  ;;  %v1715_v59 = vmul.f32 0.70710677, %v1709_v57  ;;  %v1748_v0 = vsub.f32 0.0, %v1720_v56  ;;  %v1713_v41 = vmul.f32 0.5, %v1709_v57 }
 0xabd   :  { %v1724_v60 = vadd.f32 1.0, %v1722_v36  ;;  %v1721_v61 = vand.u32 2147483647, %v1715_v59  ;;  %v1750_v1 = vmul.f32 %v1748_v0, %v1720_v56  ;;  %vm1717_vm6 = vcmp.ge.f32.partialorder %v1715_v59, 0.0 }
 0xabe   :  { %v1719_v35 = vsel %vm1717_vm6, 1.0, %v4526_v28 }
 0xabf   :  { %4448 = vrcp.f32 %v1724_v60  ;;  %v1723_v62 = vmul.f32 0.3275911, %v1721_v61  ;;  %v1749_v2 = vsub.f32 0.0, %v1721_v61  ;;  %v1752_v5 = vmul.f32 1.442695, %v1750_v1 }
 0xac1   :  { %v1725_v63 = vadd.f32 1.0, %v1723_v62  ;;  %v1751_v6 = vmul.f32 %v1749_v2, %v1721_v61 }
 0xac3   :  { %4450 = vrcp.f32 %v1725_v63  ;;  %v1754_v11 = vmul.f32 1.442695, %v1751_v6 }
 0xac4   :  { %4452 = vpow2.f32 %v1752_v5 }
 0xac5   :  { %4454 = vpow2.f32 %v1754_v11 }
 0xacc   :  { %v4449_v4 = vpop.eup %4448 }
 0xacd   :  { %v1730_v3 = vmul.f32 1.0614054, %v4449_v4 }
 0xacf   :  { %v1732_v7 = vadd.f32 -1.4531521, %v1730_v3 }
 0xad0   :  { %v4451_v8 = vpop.eup %4450 }
 0xad1   :  { %v1734_v9 = vmul.f32 %v4449_v4, %v1732_v7  ;;  %v1731_v10 = vmul.f32 1.0614054, %v4451_v8  ;;  %v4453_v23 = vpop.eup %4452 }
 0xad2   :  { %v4455_v27 = vpop.eup %4454 }
 0xad3   :  { %v1736_v40 = vadd.f32 1.4214138, %v1734_v9  ;;  %v1733_v12 = vadd.f32 -1.4531521, %v1731_v10 }
 0xad5   :  { %v1738_v13 = vmul.f32 %v4449_v4, %v1736_v40  ;;  %v1735_v15 = vmul.f32 %v4451_v8, %v1733_v12  ;;  %v3907_v40 = vld [vmem:[%s5208_s13] ss:$0 sm:$0xff] }
 0xad7   :  { %v1740_v16 = vadd.f32 -0.28449672, %v1738_v13  ;;  %v1737_v17 = vadd.f32 1.4214138, %v1735_v15 }
 0xad9   :  { %v1742_v18 = vmul.f32 %v4449_v4, %v1740_v16  ;;  %v1739_v19 = vmul.f32 %v4451_v8, %v1737_v17  ;;  %v3908_v16 = vld [vmem:[%s5209_s14] ss:$0 sm:$0xff] }
 0xadb   :  { %v1744_v20 = vadd.f32 0.2548296, %v1742_v18  ;;  %v1741_v21 = vadd.f32 -0.28449672, %v1739_v19 }
 0xadd   :  { %v1746_v31 = vmul.f32 %v4449_v4, %v1744_v20  ;;  %v1743_v22 = vmul.f32 %v4451_v8, %v1741_v21  ;;  %v4395_v4 = vld [vmem:[%s5233_s23 + $0x10] sm:$0xff]   ;;  %v3914_v21 = vld [vmem:[%s5199_s4 + $0x1] ss:$0 sm:$0xff]  ;;  %s5236_s4 = smov 56  }
 0xadf   :  { %v1756_v32 = vmul.f32 %v4453_v23, %v1746_v31  ;;  %v1745_v24 = vadd.f32 0.2548296, %v1743_v22 }
 0xae1   :  { %v1758_v25 = vsub.f32 1.0, %v1756_v32  ;;  %v1747_v26 = vmul.f32 %v4451_v8, %v1745_v24 }
 0xae3   :  { %v1760_v30 = vmul.f32 %v1758_v25, %v1718_v29  ;;  %v1757_v33 = vmul.f32 %v4455_v27, %v1747_v26 }
 0xae5   :  { %v1759_v34 = vsub.f32 1.0, %v1757_v33  ;;  %v1762_v37 = vadd.f32 1.0, %v1760_v30 }
 0xae7   :  { %v1761_v38 = vmul.f32 %v1759_v34, %v1719_v35  ;;  %v1764_v45 = vmul.f32 %v1762_v37, %v1712_v39 }
 0xae9   :  { %v1763_v42 = vadd.f32 1.0, %v1761_v38 }
 0xaeb   :  { %v1765_v46 = vmul.f32 %v1763_v42, %v1713_v41 }
 0xaed   :  { %v1774_v47 = vpack.c.bf16 %v1765_v46, %v1764_v45 }
 0xaef   :  { %4202 = vmatmul.mubr.msk.bf16.vlgmr.msra.gmra.mxu1 %vm1806_vm7, %v1774_v47 }
 0xaf0   :  { %4225 = vmatprep.mubr.msk.f32.mxu1 %vm4511_vm1, %v4510_v14 }
 0xbaf   :  { %v1844_v49 = vpop.f32.mrf.mxu1 }
 0xbb0   :  { %v1845_v50 = vadd.f32 %v3901_v48, %v1844_v49 }
 0xbb1   :  { %v4203_v51 = vpop.f32.mrf.mxu1 }
 0xbb2   :  { %v1851_v52 = vadd.f32 %v1845_v50, %v4853_v43 }
 0xbb3   :  { %v1847_v53 = vpop.f32.mrf.mxu1 }
 0xbb4   :  { %v1848_v54 = vadd.f32 %v3901_v48, %v1847_v53  ;;  %v1855_v55 = vsel %vm67_vm0, %v1851_v52, 0.0 }
 0xbb5   :  { %1856 = vadd.xlane.f32.xlu1 %v1855_v55  ;;  %v4204_v56 = vpop.f32.mrf.mxu1 }
 0xbb6   :  { %v1852_v57 = vadd.f32 %v1848_v54, %v4855_v44  ;;  %v4394_v44 = vld [vmem:[%s5233_s23 + $0x18] sm:$0xff]  }
 0xbb7   :  { %4206 = vmatpush3.bf16.msra.mxu0 %v4394_v44 }
 0xbb8   :  { %v1858_v58 = vsel %vm67_vm0, %v1852_v57, 0.0  ;;  %4207 = vmatprep.subr.bf16.mxu0 %v4510_v14 }
 0xbb9   :  { %1859 = vadd.xlane.f32.xlu0 %v1858_v58 }
 0xbbb   :  { %4208 = vmatpush3.bf16.msra.mxu0 %v4395_v4 }
 0xbbc   :  { %4213 = vmatprep.subr.mxu0 %v4510_v14 }
 0xc3e   :  { %v1857_v36 = vpop.xlane.xlu1 %1856 }
 0xc3f   :  { %v1861_v59 = vmul.f32 0.03125, %v1857_v36 }
 0xc41   :  { %v1863_v60 = vsub.f32 %v1851_v52, %v1861_v59 }
 0xc42   :  { %v1860_v61 = vpop.xlane.xlu0 %1859 }
 0xc43   :  { %v1862_v62 = vmul.f32 0.03125, %v1860_v61  ;;  %v1865_v63 = vmul.f32 %v1863_v60, %v1863_v60 }
 0xc45   :  { %v1864_v0 = vsub.f32 %v1852_v57, %v1862_v62  ;;  %v1867_v43 = vsel %vm67_vm0, %v1865_v63, 0.0 }
 0xc46   :  { %1868 = vadd.xlane.f32.xlu1 %v1867_v43 }
 0xc47   :  { %v1866_v1 = vmul.f32 %v1864_v0, %v1864_v0 }
 0xc49   :  { %v1870_v2 = vsel %vm67_vm0, %v1866_v1, 0.0 }
 0xc4a   :  { %1871 = vadd.xlane.f32.xlu0 %v1870_v2 }
 0xccf   :  { %v1869_v3 = vpop.xlane.xlu1 %1868 }
 0xcd0   :  { %v1873_v5 = vmul.f32 0.03125, %v1869_v3 }
 0xcd2   :  { %v1875_v6 = vadd.f32 1e-12, %v1873_v5 }
 0xcd3   :  { %v1872_v7 = vpop.xlane.xlu0 %1871 }
 0xcd4   :  { %4456 = vrsqrt.f32 %v1875_v6  ;;  %v1874_v8 = vmul.f32 0.03125, %v1872_v7 }
 0xcd6   :  { %v1876_v9 = vadd.f32 1e-12, %v1874_v8 }
 0xcd8   :  { %4458 = vrsqrt.f32 %v1876_v9 }
 0xce1   :  { %v4457_v10 = vpop.eup %4456 }
 0xce2   :  { %v1879_v11 = vmul.f32 %v4457_v10, %v1863_v60 }
 0xce4   :  { %v1887_v15 = vmul.f32 %v3907_v40, %v1879_v11 }
 0xce5   :  { %v4459_v12 = vpop.eup %4458 }
 0xce6   :  { %v1880_v13 = vmul.f32 %v4459_v12, %v1864_v0  ;;  %v4909_v18 = vadd.f32 %v3908_v16, %v1887_v15 }
 0xce8   :  { %v1888_v17 = vmul.f32 %v3907_v40, %v1880_v13 }
 0xcea   :  { %v4911_v19 = vadd.f32 %v3908_v16, %v1888_v17 }
 0xcec   :  { %v1902_v20 = vpack.c.bf16 %v4911_v19, %v4909_v18 }
 0xcee   :  { %4210 = vmatmul.mubr.msk.bf16.vlgmr.msra.gmra.mxu0 %vm67_vm0, %v1902_v20 }
 0xcef   :  { %4215 = vmatprep.mubr.msk.f32.mxu0 %vm4511_vm1, %v4510_v14 }
 0xdae   :  { %v1960_v31 = vpop.f32.mrf.mxu0 }
 0xdaf   :  { %v4921_v22 = vadd.f32 %v3914_v21, %v1960_v31 }
 0xdb0   :  { %v4211_v23 = vpop.f32.mrf.mxu0 }
 0xdb1   :  { %2133 = vrot.lane.b32.xlu0 %v4921_v22, %s4513_s3  ;;  %1968 = vrot.lane.b32.xlu1 %v4921_v22, %s4512_s21 }
 0xdb2   :  { %v1963_v32 = vpop.f32.mrf.mxu0 }
 0xdb3   :  { %v4931_v25 = vadd.f32 %v3914_v21, %v1963_v32 }
 0xdb4   :  { %v4212_v24 = vpop.f32.mrf.mxu0 }
 0xdb5   :  { %2463 = vrot.lane.b32.xlu0 %v4921_v22, %s4515_s1  ;;  %2131 = vrot.lane.b32.xlu1 %v4921_v22, %s4516_s24 }
 0xdb9   :  { %2298 = vrot.lane.b32.xlu1 %v4921_v22, %s4514_s22  ;;  %2642 = vrot.lane.b32.xlu0 %v4931_v25, %s4512_s21  ;;  %s5237_s21 = smov 48  }
 0xdbd   :  { %2296 = vrot.lane.b32.xlu1 %v4921_v22, %s4517_s25  ;;  %2805 = vrot.lane.b32.xlu0 %v4931_v25, %s4516_s24 }
 0xdc1   :  { %2461 = vrot.lane.b32.xlu1 %v4921_v22, %s4518_s2  ;;  %2970 = vrot.lane.b32.xlu0 %v4931_v25, %s4517_s25 }
 0xdc5   :  { %2807 = vrot.lane.b32.xlu1 %v4931_v25, %s4513_s3  ;;  %3135 = vrot.lane.b32.xlu0 %v4931_v25, %s4518_s2  ;;  %s5238_s3 = smov 64  }
 0xdc9   :  { %2972 = vrot.lane.b32.xlu1 %v4931_v25, %s4514_s22  ;;  %s5239_s22 = smov 40  }
 0xdcd   :  { %3137 = vrot.lane.b32.xlu1 %v4931_v25, %s4515_s1 }
 0xe23   :  { %v2134_v26 = vpop.permute.xlu0 %2133  ;;  %v1969_v27 = vpop.permute.xlu1 %1968 }
 0xe24   :  { %4214 = vmatpush3.xpose.msk.msra.mxu0 %vm182_vm2, %v1969_v27  ;;  %4224 = vmatpush3.xpose.msk.msra.mxu1 %vm182_vm2, %v2134_v26 }
 0xe25   :  { %4233 = vmatprep.subr.mxu1 %v4510_v14  ;;  %4218 = vmatprep.subr.mxu0 %v4510_v14 }
 0xe27   :  { %4216 = vmatmul.mubr.msk.f32.vlgmr.msra.gmra.mxu0 %vm182_vm2, %v4921_v22  ;;  %v2132_v29 = vpop.permute.xlu1 %2131  ;;  %v2464_v30 = vpop.permute.xlu0 %2463 }
 0xe28   :  { %4226 = vmatmul.mubr.msk.f32.vlgmr.msra.gmra.mxu1 %vm182_vm2, %v2132_v29  ;;  %4220 = vmatprep.mubr.msk.f32.mxu0 %vm4511_vm1, %v4510_v14 }
 0xe29   :  { %4235 = vmatprep.mubr.msk.f32.mxu1 %vm4511_vm1, %v4510_v14 }
 0xe2b   :  { %v2299_v33 = vpop.permute.xlu1 %2298  ;;  %v2643_v35 = vpop.permute.xlu0 %2642 }
 0xe2c   :  { %4234 = vmatpush3.xpose.msk.msra.mxu1 %vm182_vm2, %v2299_v33 }
 0xe2d   :  { %4243 = vmatprep.subr.mxu1 %v4510_v14 }
 0xe2f   :  { %v2297_v34 = vpop.permute.xlu1 %2296  ;;  %v2806_v38 = vpop.permute.xlu0 %2805 }
 0xe30   :  { %4236 = vmatmul.mubr.msk.f32.vlgmr.msra.gmra.mxu1 %vm182_vm2, %v2297_v34 }
 0xe31   :  { %4244 = vmatpush3.xpose.msk.msra.mxu1 %vm182_vm2, %v2464_v30  ;;  %4245 = vmatprep.mubr.msk.f32.mxu1 %vm4511_vm1, %v4510_v14 }
 0xe32   :  { %4253 = vmatprep.subr.mxu1 %v4510_v14 }
 0xe33   :  { %v2462_v37 = vpop.permute.xlu1 %2461  ;;  %v2971_v42 = vpop.permute.xlu0 %2970 }
 0xe34   :  { %4246 = vmatmul.mubr.msk.f32.vlgmr.msra.gmra.mxu1 %vm182_vm2, %v2462_v37 }
 0xe35   :  { %4254 = vmatpush3.xpose.msk.msra.mxu1 %vm182_vm2, %v2643_v35  ;;  %4255 = vmatprep.mubr.msk.f32.mxu1 %vm4511_vm1, %v4510_v14 }
 0xe36   :  { %4263 = vmatprep.subr.mxu1 %v4510_v14 }
 0xe37   :  { %v2808_v39 = vpop.permute.xlu1 %2807  ;;  %v3136_v46 = vpop.permute.xlu0 %3135 }
 0xe38   :  { %4256 = vmatmul.mubr.msk.f32.vlgmr.msra.gmra.mxu1 %vm182_vm2, %v4931_v25 }
 0xe39   :  { %4264 = vmatpush3.xpose.msk.msra.mxu1 %vm182_vm2, %v2808_v39  ;;  %4265 = vmatprep.mubr.msk.f32.mxu1 %vm4511_vm1, %v4510_v14 }
 0xe3a   :  { %4273 = vmatprep.subr.mxu1 %v4510_v14 }
 0xe3b   :  { %v2973_v41 = vpop.permute.xlu1 %2972 }
 0xe3c   :  { %4266 = vmatmul.mubr.msk.f32.vlgmr.msra.gmra.mxu1 %vm182_vm2, %v2806_v38 }
 0xe3d   :  { %4274 = vmatpush3.xpose.msk.msra.mxu1 %vm182_vm2, %v2973_v41  ;;  %4275 = vmatprep.mubr.msk.f32.mxu1 %vm4511_vm1, %v4510_v14 }
 0xe3e   :  { %4283 = vmatprep.subr.mxu1 %v4510_v14 }
 0xe3f   :  { %v3138_v45 = vpop.permute.xlu1 %3137 }
 0xe40   :  { %4276 = vmatmul.mubr.msk.f32.vlgmr.msra.gmra.mxu1 %vm182_vm2, %v2971_v42 }
 0xe41   :  { %4284 = vmatpush3.xpose.msk.msra.mxu1 %vm182_vm2, %v3138_v45  ;;  %4285 = vmatprep.mubr.msk.f32.mxu1 %vm4511_vm1, %v4510_v14 }
 0xe42   :  { %4293 = vmatprep.subr.bf16.mxu1 %v4510_v14 }
 0xe44   :  { %4286 = vmatmul.mubr.msk.f32.vlgmr.msra.gmra.mxu1 %vm182_vm2, %v3136_v46 }
 0xe45   :  { %4297 = vmatprep.mubr.msk.bf16.mxu1 %vm4511_vm1, %v4510_v14 }
 0xee7   :  { %v2040_v47 = vpop.f32.mrf.mxu0 }
 0xee8   :  { %v2205_v48 = vpop.f32.mrf.mxu1  ;;  %v2044_v49 = vsel %vm182_vm2, %v2040_v47, -inf }
 0xee9   :  { %2045 = vmax.xlane.f32.xlu1 %v2044_v49  ;;  %v4217_v50 = vpop.f32.mrf.mxu0  ;;  %v2209_v51 = vsel %vm182_vm2, %v2205_v48, -inf }
 0xeea   :  { %v4227_v52 = vpop.f32.mrf.mxu1  ;;  %2210 = vmax.xlane.f32.xlu0 %v2209_v51 }
 0xef0   :  { %v2370_v53 = vpop.f32.mrf.mxu1 }
 0xef1   :  { %v2374_v54 = vsel %vm182_vm2, %v2370_v53, -inf }
 0xef2   :  { %v4237_v55 = vpop.f32.mrf.mxu1  ;;  %2375 = vmax.xlane.f32.xlu0 %v2374_v54 }
 0xef4   :  { %v2535_v56 = vpop.f32.mrf.mxu1 }
 0xef5   :  { %v2539_v57 = vsel %vm182_vm2, %v2535_v56, -inf }
 0xef6   :  { %v4247_v58 = vpop.f32.mrf.mxu1  ;;  %2540 = vmax.xlane.f32.xlu0 %v2539_v57 }
 0xef8   :  { %v2714_v36 = vpop.f32.mrf.mxu1 }
 0xef9   :  { %v2718_v59 = vsel %vm182_vm2, %v2714_v36, -inf }
 0xefa   :  { %v4257_v60 = vpop.f32.mrf.mxu1  ;;  %2719 = vmax.xlane.f32.xlu1 %v2718_v59 }
 0xefc   :  { %v2879_v61 = vpop.f32.mrf.mxu1 }
 0xefd   :  { %v2883_v62 = vsel %vm182_vm2, %v2879_v61, -inf }
 0xefe   :  { %2884 = vmax.xlane.f32.xlu0 %v2883_v62  ;;  %v4267_v63 = vpop.f32.mrf.mxu1 }
 0xf00   :  { %v3044_v0 = vpop.f32.mrf.mxu1 }
 0xf01   :  { %v3048_v43 = vsel %vm182_vm2, %v3044_v0, -inf }
 0xf02   :  { %v4277_v1 = vpop.f32.mrf.mxu1  ;;  %3049 = vmax.xlane.f32.xlu1 %v3048_v43 }
 0xf04   :  { %v3209_v2 = vpop.f32.mrf.mxu1 }
 0xf05   :  { %v3213_v44 = vsel %vm182_vm2, %v3209_v2, -inf }
 0xf06   :  { %3214 = vmax.xlane.f32.xlu0 %v3213_v44  ;;  %v4287_v4 = vpop.f32.mrf.mxu1 }
 0xf13   :  { %2220 = vrot.lane.b32.xlu1 %v4921_v22, %s5236_s4 }
 0xf17   :  { %2385 = vrot.lane.b32.xlu1 %v4921_v22, %s5237_s21 }
 0xf1c   :  { %2055 = vrot.lane.b32.xlu0 %v4921_v22, %s5238_s3 }
 0xf72   :  { %v2046_v3 = vpop.xlane.xlu1 %2045 }
 0xf73   :  { %v2047_v5 = vsub.f32 %v2040_v47, %v2046_v3  ;;  %v2211_v6 = vpop.xlane.xlu0 %2210 }
 0xf74   :  { %v2212_v7 = vsub.f32 %v2205_v48, %v2211_v6 }
 0xf75   :  { %v2048_v8 = vmul.f32 1.442695, %v2047_v5 }
 0xf76   :  { %v2213_v9 = vmul.f32 1.442695, %v2212_v7 }
 0xf77   :  { %4460 = vpow2.f32 %v2048_v8 }
 0xf78   :  { %4462 = vpow2.f32 %v2213_v9 }
 0xf7b   :  { %v2376_v10 = vpop.xlane.xlu0 %2375 }
 0xf7c   :  { %v2377_v21 = vsub.f32 %v2370_v53, %v2376_v10 }
 0xf7e   :  { %v2378_v32 = vmul.f32 1.442695, %v2377_v21 }
 0xf7f   :  { %v2541_v15 = vpop.xlane.xlu0 %2540 }
 0xf80   :  { %v2542_v31 = vsub.f32 %v2535_v56, %v2541_v15  ;;  %4464 = vpow2.f32 %v2378_v32 }
 0xf82   :  { %v2543_v26 = vmul.f32 1.442695, %v2542_v31 }
 0xf83   :  { %v2720_v23 = vpop.xlane.xlu1 %2719 }
 0xf84   :  { %v4461_v11 = vpop.eup %4460  ;;  %v2721_v24 = vsub.f32 %v2714_v36, %v2720_v23  ;;  %4466 = vpow2.f32 %v2543_v26  ;;  %v4396_v26 = vld [vmem:[%s5200_s5 + $0x18] sm:$0xff]  }
 0xf85   :  { %v5009_v40 = vpop.eup %4462  ;;  %v2050_v12 = vsel %vm182_vm2, %v4461_v11, 0.0  ;;  %4294 = vmatpush3.bf16.msra.mxu1 %v4396_v26 }
 0xf86   :  { %2051 = vadd.xlane.f32.xlu1 %v2050_v12  ;;  %v2215_v13 = vsel %vm182_vm2, %v5009_v40, 0.0  ;;  %v2722_v30 = vmul.f32 1.442695, %v2721_v24  ;;  %4295 = vmatprep.subr.bf16.mxu1 %v4510_v14 }
 0xf87   :  { %2216 = vadd.xlane.f32.xlu0 %v2215_v13  ;;  %v2885_v16 = vpop.xlane.xlu0 %2884 }
 0xf88   :  { %v2886_v27 = vsub.f32 %v2879_v61, %v2885_v16  ;;  %4468 = vpow2.f32 %v2722_v30  ;;  %v4397_v30 = vld [vmem:[%s5200_s5 + $0x10] sm:$0xff]  }
 0xf89   :  { %4296 = vmatpush3.bf16.msra.mxu1 %v4397_v30 }
 0xf8a   :  { %v2887_v34 = vmul.f32 1.442695, %v2886_v27  ;;  %4309 = vmatprep.subr.bf16.mxu1 %v4510_v14 }
 0xf8b   :  { %v3050_v29 = vpop.xlane.xlu1 %3049 }
 0xf8c   :  { %v3051_v33 = vsub.f32 %v3044_v0, %v3050_v29  ;;  %4470 = vpow2.f32 %v2887_v34 }
 0xf8e   :  { %v3052_v35 = vmul.f32 1.442695, %v3051_v33 }
 0xf8f   :  { %v3215_v17 = vpop.xlane.xlu0 %3214  ;;  %v2221_v53 = vpop.permute.xlu1 %2220 }
 0xf90   :  { %v3216_v37 = vsub.f32 %v3209_v2, %v3215_v17  ;;  %4472 = vpow2.f32 %v3052_v35 }
 0xf92   :  { %v3217_v38 = vmul.f32 1.442695, %v3216_v37 }
 0xf93   :  { %v2056_v20 = vpop.permute.xlu0 %2055  ;;  %v2386_v54 = vpop.permute.xlu1 %2385 }
 0xf94   :  { %4219 = vmatpush3.msra.mxu0 %v2056_v20  ;;  %4474 = vpow2.f32 %v3217_v38 }
 0xf95   :  { %4228 = vmatprep.subr.mxu0 %v4510_v14 }
 0xf97   :  { %2729 = vrot.lane.b32.xlu1 %v4931_v25, %s5238_s3 }
 0xf9d   :  { %2550 = vrot.lane.b32.xlu0 %v4921_v22, %s5239_s22  ;;  %v4465_v22 = vpop.eup %4464 }
 0xf9e   :  { %v4467_v39 = vpop.eup %4466  ;;  %v2380_v41 = vsel %vm182_vm2, %v4465_v22, 0.0 }
 0xf9f   :  { %v5020_v42 = vpop.eup %4468  ;;  %v2545_v45 = vsel %vm182_vm2, %v4467_v39, 0.0 }
 0xfa0   :  { %v5023_v46 = vpop.eup %4470  ;;  %v2724_v47 = vsel %vm182_vm2, %v5020_v42, 0.0 }
 0xfa1   :  { %v5027_v48 = vpop.eup %4472  ;;  %v2889_v49 = vsel %vm182_vm2, %v5023_v46, 0.0 }
 0xfa2   :  { %v3054_v50 = vsel %vm182_vm2, %v5027_v48, 0.0  ;;  %v5033_v51 = vpop.eup %4474 }
 0xfa3   :  { %v3219_v52 = vsel %vm182_vm2, %v5033_v51, 0.0 }
 0xfbb   :  { %2381 = vadd.xlane.f32.xlu1 %v2380_v41 }
 0xfbc   :  { %2546 = vadd.xlane.f32.xlu0 %v2545_v45 }
 0xfbf   :  { %2725 = vadd.xlane.f32.xlu1 %v2724_v47 }
 0xfc0   :  { %2890 = vadd.xlane.f32.xlu0 %v2889_v49 }
 0xfc3   :  { %3055 = vadd.xlane.f32.xlu1 %v3054_v50 }
 0xfc7   :  { %3220 = vadd.xlane.f32.xlu1 %v3219_v52 }
 0xfd6   :  { %2894 = vrot.lane.b32.xlu0 %v4931_v25, %s5236_s4 }
 0xfd8   :  { %3059 = vrot.lane.b32.xlu1 %v4931_v25, %s5237_s21 }
 0xfda   :  { %3224 = vrot.lane.b32.xlu0 %v4931_v25, %s5239_s22 }
0x100f   :  { %v2052_v55 = vpop.xlane.xlu1 %2051 }
0x1010   :  { %4476 = vrcp.f32 %v2052_v55  ;;  %v2217_v56 = vpop.xlane.xlu0 %2216 }
0x1011   :  { %4478 = vrcp.f32 %v2217_v56 }
0x1013   :  { %v2730_v25 = vpop.permute.xlu1 %2729 }
0x1014   :  { %v2551_v60 = vpop.permute.xlu0 %2550 }
0x101d   :  { %v4477_v57 = vpop.eup %4476 }
0x101e   :  { %v2054_v58 = vmul.f32 %v4477_v57, %v4461_v11  ;;  %v4479_v36 = vpop.eup %4478 }
0x101f   :  { %v2219_v59 = vmul.f32 %v4479_v36, %v5009_v40 }
0x1020   :  { %4221 = vmatmul.mubr.msk.f32.vlgmr.msra.gmra.mxu0 %vm182_vm2, %v2054_v58 }
0x1021   :  { %4229 = vmatpush3.msra.mxu0 %v2221_v53  ;;  %4230 = vmatprep.mubr.msk.f32.mxu0 %vm4511_vm1, %v4510_v14 }
0x1022   :  { %4238 = vmatprep.subr.mxu0 %v4510_v14 }
0x1024   :  { %4231 = vmatmul.mubr.msk.f32.vlgmr.msra.gmra.mxu0 %vm182_vm2, %v2219_v59 }
0x1025   :  { %4239 = vmatpush3.msra.mxu0 %v2386_v54  ;;  %4240 = vmatprep.mubr.msk.f32.mxu0 %vm4511_vm1, %v4510_v14 }
0x1026   :  { %4248 = vmatprep.subr.mxu0 %v4510_v14 }
0x1044   :  { %v2382_v61 = vpop.xlane.xlu1 %2381 }
0x1045   :  { %4480 = vrcp.f32 %v2382_v61  ;;  %v2547_v62 = vpop.xlane.xlu0 %2546 }
0x1046   :  { %4482 = vrcp.f32 %v2547_v62 }
0x1048   :  { %v2726_v63 = vpop.xlane.xlu1 %2725 }
0x1049   :  { %4484 = vrcp.f32 %v2726_v63  ;;  %v2891_v0 = vpop.xlane.xlu0 %2890 }
0x104a   :  { %4486 = vrcp.f32 %v2891_v0 }
0x104c   :  { %v3056_v43 = vpop.xlane.xlu1 %3055 }
0x104d   :  { %4488 = vrcp.f32 %v3056_v43  ;;  %v2895_v8 = vpop.permute.xlu0 %2894 }
0x1050   :  { %v3221_v4 = vpop.xlane.xlu1 %3220 }
0x1051   :  { %4490 = vrcp.f32 %v3221_v4  ;;  %v3225_v13 = vpop.permute.xlu0 %3224 }
0x1052   :  { %v4481_v1 = vpop.eup %4480 }
0x1053   :  { %v2384_v2 = vmul.f32 %v4481_v1, %v4465_v22  ;;  %v4483_v44 = vpop.eup %4482 }
0x1054   :  { %v2549_v3 = vmul.f32 %v4483_v44, %v4467_v39  ;;  %v3060_v11 = vpop.permute.xlu1 %3059 }
0x1055   :  { %4241 = vmatmul.mubr.msk.f32.vlgmr.msra.gmra.mxu0 %vm182_vm2, %v2384_v2 }
0x1056   :  { %4249 = vmatpush3.msra.mxu0 %v2551_v60  ;;  %4250 = vmatprep.mubr.msk.f32.mxu0 %vm4511_vm1, %v4510_v14  ;;  %v4485_v5 = vpop.eup %4484 }
0x1057   :  { %4258 = vmatprep.subr.mxu0 %v4510_v14  ;;  %v2728_v6 = vmul.f32 %v4485_v5, %v5020_v42  ;;  %v4487_v7 = vpop.eup %4486 }
0x1058   :  { %v2893_v9 = vmul.f32 %v4487_v7, %v5023_v46 }
0x1059   :  { %4251 = vmatmul.mubr.msk.f32.vlgmr.msra.gmra.mxu0 %vm182_vm2, %v2549_v3 }
0x105a   :  { %4259 = vmatpush3.msra.mxu0 %v2730_v25  ;;  %4260 = vmatprep.mubr.msk.f32.mxu0 %vm4511_vm1, %v4510_v14  ;;  %v4489_v10 = vpop.eup %4488  ;;  %v3947_v25 = vld [vmem:[%s5201_s6 + $0x1] ss:$0 sm:$0xff] }
0x105b   :  { %4268 = vmatprep.subr.mxu0 %v4510_v14  ;;  %v3058_v40 = vmul.f32 %v4489_v10, %v5027_v48 }
0x105d   :  { %4261 = vmatmul.mubr.msk.f32.vlgmr.msra.gmra.mxu0 %vm182_vm2, %v2728_v6 }
0x105e   :  { %4269 = vmatpush3.msra.mxu0 %v2895_v8  ;;  %4270 = vmatprep.mubr.msk.f32.mxu0 %vm4511_vm1, %v4510_v14  ;;  %v4491_v12 = vpop.eup %4490 }
0x105f   :  { %4278 = vmatprep.subr.mxu0 %v4510_v14  ;;  %v3223_v15 = vmul.f32 %v4491_v12, %v5033_v51  ;;  %v4399_v12 = vld [vmem:[%s5202_s9 + $0x10] sm:$0xff]  }
0x1061   :  { %4271 = vmatmul.mubr.msk.f32.vlgmr.msra.gmra.mxu0 %vm182_vm2, %v2893_v9 }
0x1062   :  { %4279 = vmatpush3.msra.mxu0 %v3060_v11  ;;  %4280 = vmatprep.mubr.msk.f32.mxu0 %vm4511_vm1, %v4510_v14 }
0x1063   :  { %4288 = vmatprep.subr.mxu0 %v4510_v14 }
0x1065   :  { %4281 = vmatmul.mubr.msk.f32.vlgmr.msra.gmra.mxu0 %vm182_vm2, %v3058_v40 }
0x1066   :  { %4289 = vmatpush3.msra.mxu0 %v3225_v13  ;;  %4290 = vmatprep.mubr.msk.f32.mxu0 %vm4511_vm1, %v4510_v14 }
0x1067   :  { %4301 = vmatprep.subr.bf16.mxu0 %v4510_v14 }
0x1069   :  { %4291 = vmatmul.mubr.msk.f32.vlgmr.msra.gmra.mxu0 %vm182_vm2, %v3223_v15 }
0x106a   :  { %4305 = vmatprep.mubr.msk.bf16.mxu0 %vm4511_vm1, %v4510_v14 }
0x10e0   :  { %v2127_v16 = vpop.f32.mrf.mxu0 }
0x10e2   :  { %v4222_v17 = vpop.f32.mrf.mxu0 }
0x10e4   :  { %v2292_v20 = vpop.f32.mrf.mxu0 }
0x10e6   :  { %v4232_v21 = vpop.f32.mrf.mxu0 }
0x1115   :  { %v2457_v31 = vpop.f32.mrf.mxu0 }
0x1117   :  { %v4242_v23 = vpop.f32.mrf.mxu0 }
0x1119   :  { %v2622_v32 = vpop.f32.mrf.mxu0 }
0x111b   :  { %v4252_v24 = vpop.f32.mrf.mxu0 }
0x111d   :  { %v2801_v27 = vpop.f32.mrf.mxu0 }
0x111f   :  { %v4262_v29 = vpop.f32.mrf.mxu0 }
0x1120   :  { %v3954_v29 = vld [vmem:[%s5204_s8 + $0x1] ss:$0 sm:$0xff] }
0x1121   :  { %v2966_v33 = vpop.f32.mrf.mxu0 }
0x1122   :  { %v4369_v34 = vpack.i.bf16 %v2966_v33, %v2292_v20 }
0x1123   :  { %v4272_v35 = vpop.f32.mrf.mxu0 }
0x1124   :  { %4370 = vrot.lane.b32.xlu1 %v4369_v34, %s5240_s30 }
0x1125   :  { %v3131_v37 = vpop.f32.mrf.mxu0 }
0x1126   :  { %v4374_v38 = vpack.i.bf16 %v3131_v37, %v2457_v31  ;;  %v4400_v37 = vld [vmem:[%s5205_s11 + $0x38] sm:$0xff]  }
0x1127   :  { %v4282_v22 = vpop.f32.mrf.mxu0 }
0x1128   :  { %4375 = vrot.lane.b32.xlu0 %v4374_v38, %s5241_s20  ;;  %v4401_v38 = vld [vmem:[%s5205_s11 + $0x30] sm:$0xff]   ;;  %v4402_v22 = vld [vmem:[%s5205_s11 + $0x28] sm:$0xff]  }
0x1129   :  { %v3296_v39 = vpop.f32.mrf.mxu0 }
0x112a   :  { %v4379_v41 = vpack.i.bf16 %v3296_v39, %v2622_v32  ;;  %v3953_v32 = vld [vmem:[%s5203_s7 + $0x1] ss:$0 sm:$0xff] }
0x112b   :  { %v4292_v42 = vpop.f32.mrf.mxu0  ;;  %v4403_v39 = vld [vmem:[%s5205_s11 + $0x20] sm:$0xff]  }
0x112c   :  { %4380 = vrot.lane.b32.xlu1 %v4379_v41, %s5242_s0  ;;  %v3960_v41 = vld [vmem:[%s5206_s10 + $0x1] ss:$0 sm:$0xff] }
0x1196   :  { %v4371_v45 = vpop.permute.xlu1 %4370 }
0x1197   :  { %v4373_v47 = vunpack.i.h.bf16 %v4371_v45  ;;  %v4372_v48 = vunpack.i.l.bf16 %v4371_v45 }
0x1199   :  { %v3312_v52 = vsel %vm182_vm2, %v2801_v27, %v4373_v47  ;;  %v2638_v53 = vsel %vm182_vm2, %v2127_v16, %v4372_v48  ;;  %vm3719_vm2 = vcmask 1046528  }
0x119a   :  { %v4376_v46 = vpop.permute.xlu0 %4375 }
0x119b   :  { %v4378_v49 = vunpack.i.h.bf16 %v4376_v46  ;;  %v4377_v50 = vunpack.i.l.bf16 %v4376_v46 }
0x119d   :  { %v3313_v56 = vsel %vm852_vm3, %v3312_v52, %v4378_v49  ;;  %v2639_v57 = vsel %vm852_vm3, %v2638_v53, %v4377_v50 }
0x119e   :  { %v4381_v51 = vpop.permute.xlu1 %4380 }
0x119f   :  { %v4383_v54 = vunpack.i.h.bf16 %v4381_v51  ;;  %v4382_v55 = vunpack.i.l.bf16 %v4381_v51 }
0x11a1   :  { %v3314_v58 = vsel %vm854_vm4, %v3313_v56, %v4383_v54  ;;  %v2640_v36 = vsel %vm854_vm4, %v2639_v57, %v4382_v55 }
0x11a2   :  { %v3320_v59 = vpack.c.bf16 %v3314_v58, %v2640_v36 }
0x11a4   :  { %4298 = vmatmul.mubr.msk.bf16.vlgmr.msra.gmra.mxu1 %vm67_vm0, %v3320_v59 }
0x11a5   :  { %4317 = vmatprep.mubr.msk.bf16.mxu1 %vm4511_vm1, %v4510_v14  ;;  %4310 = vmatpush3.bf16.msra.mxu1 %v4400_v37 }
0x11a6   :  { %4311 = vmatprep.subr.bf16.mxu1 %v4510_v14 }
0x11a9   :  { %4312 = vmatpush3.bf16.msra.mxu1 %v4401_v38 }
0x11aa   :  { %4313 = vmatprep.subr.bf16.mxu1 %v4510_v14 }
0x11ad   :  { %4314 = vmatpush3.bf16.msra.mxu1 %v4402_v22  ;;  %v3973_v22 = vld [vmem:[%s5207_s12 + $0x1] ss:$0 sm:$0xff] }
0x11ae   :  { %4315 = vmatprep.subr.bf16.mxu1 %v4510_v14 }
0x11b1   :  { %4316 = vmatpush3.bf16.msra.mxu1 %v4403_v39 }
0x1264   :  { %v3378_v60 = vpop.f32.mrf.mxu1 }
0x1265   :  { %v3379_v61 = vadd.f32 %v3947_v25, %v3378_v60 }
0x1266   :  { %v4299_v62 = vpop.f32.mrf.mxu1 }
0x1267   :  { %v3385_v63 = vadd.f32 %v3379_v61, %v4909_v18 }
0x1268   :  { %v3381_v0 = vpop.f32.mrf.mxu1 }
0x1269   :  { %v3382_v43 = vadd.f32 %v3947_v25, %v3381_v0  ;;  %v3391_v1 = vsel %vm67_vm0, %v3385_v63, 0.0 }
0x126a   :  { %3392 = vadd.xlane.f32.xlu0 %v3391_v1  ;;  %v4300_v2 = vpop.f32.mrf.mxu1 }
0x126b   :  { %v3386_v44 = vadd.f32 %v3382_v43, %v4911_v19  ;;  %v4398_v19 = vld [vmem:[%s5202_s9 + $0x18] sm:$0xff]  }
0x126c   :  { %4302 = vmatpush3.bf16.msra.mxu0 %v4398_v19 }
0x126d   :  { %v3394_v4 = vsel %vm67_vm0, %v3386_v44, 0.0  ;;  %4303 = vmatprep.subr.bf16.mxu0 %v4510_v14 }
0x126e   :  { %3395 = vadd.xlane.f32.xlu1 %v3394_v4 }
0x1270   :  { %4304 = vmatpush3.bf16.msra.mxu0 %v4399_v12 }
0x1271   :  { %4321 = vmatprep.subr.bf16.mxu0 %v4510_v14 }
0x12f3   :  { %v3393_v3 = vpop.xlane.xlu0 %3392 }
0x12f4   :  { %v3397_v5 = vmul.f32 0.03125, %v3393_v3 }
0x12f6   :  { %v3399_v6 = vsub.f32 %v3385_v63, %v3397_v5 }
0x12f7   :  { %v3396_v7 = vpop.xlane.xlu1 %3395 }
0x12f8   :  { %v3398_v8 = vmul.f32 0.03125, %v3396_v7  ;;  %v3401_v9 = vmul.f32 %v3399_v6, %v3399_v6 }
0x12fa   :  { %v3400_v10 = vsub.f32 %v3386_v44, %v3398_v8  ;;  %v3403_v18 = vsel %vm67_vm0, %v3401_v9, 0.0 }
0x12fb   :  { %3404 = vadd.xlane.f32.xlu0 %v3403_v18 }
0x12fc   :  { %v3402_v11 = vmul.f32 %v3400_v10, %v3400_v10 }
0x12fe   :  { %v3406_v40 = vsel %vm67_vm0, %v3402_v11, 0.0 }
0x12ff   :  { %3407 = vadd.xlane.f32.xlu0 %v3406_v40 }
0x1384   :  { %v3405_v13 = vpop.xlane.xlu0 %3404 }
0x1385   :  { %v3409_v15 = vmul.f32 0.03125, %v3405_v13 }
0x1387   :  { %v3411_v16 = vadd.f32 1e-12, %v3409_v15 }
0x1388   :  { %v3408_v17 = vpop.xlane.xlu0 %3407 }
0x1389   :  { %4492 = vrsqrt.f32 %v3411_v16  ;;  %v3410_v20 = vmul.f32 0.03125, %v3408_v17 }
0x138b   :  { %v3412_v21 = vadd.f32 1e-12, %v3410_v20 }
0x138d   :  { %4494 = vrsqrt.f32 %v3412_v21 }
0x1396   :  { %v4493_v31 = vpop.eup %4492 }
0x1397   :  { %v3415_v23 = vmul.f32 %v4493_v31, %v3399_v6 }
0x1399   :  { %v3423_v27 = vmul.f32 %v3953_v32, %v3415_v23 }
0x139a   :  { %v4495_v24 = vpop.eup %4494 }
0x139b   :  { %v3416_v26 = vmul.f32 %v4495_v24, %v3400_v10  ;;  %v5122_v33 = vadd.f32 %v3954_v29, %v3423_v27 }
0x139d   :  { %v3424_v30 = vmul.f32 %v3953_v32, %v3416_v26 }
0x139f   :  { %v5124_v34 = vadd.f32 %v3954_v29, %v3424_v30 }
0x13a1   :  { %v3438_v35 = vpack.c.bf16 %v5124_v34, %v5122_v33 }
0x13a3   :  { %4306 = vmatmul.mubr.msk.bf16.vlgmr.msra.gmra.mxu0 %vm67_vm0, %v3438_v35 }
0x13a4   :  { %4325 = vmatprep.mubr.msk.bf16.mxu0 %vm4511_vm1, %v4510_v14 }
0x1463   :  { %v3496_v42 = vpop.f32.mrf.mxu0 }
0x1464   :  { %v3497_v45 = vadd.f32 %v3960_v41, %v3496_v42 }
0x1465   :  { %v4307_v46 = vpop.f32.mrf.mxu0 }
0x1466   :  { %v3505_v47 = vmul.f32 0.70710677, %v3497_v45  ;;  %v3503_v27 = vmul.f32 0.5, %v3497_v45 }
0x1467   :  { %v3499_v48 = vpop.f32.mrf.mxu0 }
0x1468   :  { %v3511_v49 = vand.u32 2147483647, %v3505_v47  ;;  %v3500_v50 = vadd.f32 %v3960_v41, %v3499_v48  ;;  %vm3507_vm8 = vcmp.ge.f32.partialorder %v3505_v47, 0.0 }
0x1469   :  { %v4308_v51 = vpop.f32.mrf.mxu0  ;;  %v3509_v20 = vsel %vm3507_vm8, 1.0, %v4526_v28 }
0x146a   :  { %v3513_v52 = vmul.f32 0.3275911, %v3511_v49  ;;  %v3506_v53 = vmul.f32 0.70710677, %v3500_v50  ;;  %v3539_v58 = vsub.f32 0.0, %v3511_v49  ;;  %v3504_v29 = vmul.f32 0.5, %v3500_v50 }
0x146c   :  { %v3515_v54 = vadd.f32 1.0, %v3513_v52  ;;  %v3512_v55 = vand.u32 2147483647, %v3506_v53  ;;  %v3541_v36 = vmul.f32 %v3539_v58, %v3511_v49  ;;  %vm3508_vm9 = vcmp.ge.f32.partialorder %v3506_v53, 0.0 }
0x146d   :  { %v3510_v32 = vsel %vm3508_vm9, 1.0, %v4526_v28 }
0x146e   :  { %4496 = vrcp.f32 %v3515_v54  ;;  %v3514_v56 = vmul.f32 0.3275911, %v3512_v55  ;;  %v3540_v59 = vsub.f32 0.0, %v3512_v55  ;;  %v3543_v61 = vmul.f32 1.442695, %v3541_v36 }
0x1470   :  { %v3516_v57 = vadd.f32 1.0, %v3514_v56  ;;  %v3542_v62 = vmul.f32 %v3540_v59, %v3512_v55  ;;  %v4405_v59 = vld [vmem:[%s5210_s15] sm:$0xff]  }
0x1472   :  { %4498 = vrcp.f32 %v3516_v57  ;;  %v3545_v2 = vmul.f32 1.442695, %v3542_v62 }
0x1473   :  { %4500 = vpow2.f32 %v3543_v61 }
0x1474   :  { %4502 = vpow2.f32 %v3545_v2 }
0x147b   :  { %v4497_v25 = vpop.eup %4496 }
0x147c   :  { %v3521_v60 = vmul.f32 1.0614054, %v4497_v25 }
0x147e   :  { %v3523_v63 = vadd.f32 -1.4531521, %v3521_v60 }
0x147f   :  { %v4499_v0 = vpop.eup %4498 }
0x1480   :  { %v3525_v43 = vmul.f32 %v4497_v25, %v3523_v63  ;;  %v3522_v1 = vmul.f32 1.0614054, %v4499_v0  ;;  %v4501_v19 = vpop.eup %4500 }
0x1481   :  { %v4503_v17 = vpop.eup %4502 }
0x1482   :  { %v3527_v44 = vadd.f32 1.4214138, %v3525_v43  ;;  %v3524_v4 = vadd.f32 -1.4531521, %v3522_v1  ;;  %v3981_v1 = vld [vmem:[%s5208_s13 + $0x1] ss:$0 sm:$0xff] }
0x1484   :  { %v3529_v3 = vmul.f32 %v4497_v25, %v3527_v44  ;;  %v3526_v5 = vmul.f32 %v4499_v0, %v3524_v4 }
0x1486   :  { %v3531_v6 = vadd.f32 -0.28449672, %v3529_v3  ;;  %v3528_v7 = vadd.f32 1.4214138, %v3526_v5  ;;  %v3982_v3 = vld [vmem:[%s5209_s14 + $0x1] ss:$0 sm:$0xff] }
0x1488   :  { %v3533_v8 = vmul.f32 %v4497_v25, %v3531_v6  ;;  %v3530_v9 = vmul.f32 %v4499_v0, %v3528_v7 }
0x148a   :  { %v3535_v10 = vadd.f32 0.2548296, %v3533_v8  ;;  %v3532_v18 = vadd.f32 -0.28449672, %v3530_v9 }
0x148c   :  { %v3537_v11 = vmul.f32 %v4497_v25, %v3535_v10  ;;  %v3534_v40 = vmul.f32 %v4499_v0, %v3532_v18 }
0x148e   :  { %v3547_v12 = vmul.f32 %v4501_v19, %v3537_v11  ;;  %v3536_v13 = vadd.f32 0.2548296, %v3534_v40 }
0x1490   :  { %v3549_v15 = vsub.f32 1.0, %v3547_v12  ;;  %v3538_v16 = vmul.f32 %v4499_v0, %v3536_v13 }
0x1492   :  { %v3551_v21 = vmul.f32 %v3549_v15, %v3509_v20  ;;  %v3548_v31 = vmul.f32 %v4503_v17, %v3538_v16 }
0x1494   :  { %v3550_v23 = vsub.f32 1.0, %v3548_v31  ;;  %v3553_v24 = vadd.f32 1.0, %v3551_v21 }
0x1496   :  { %v3552_v26 = vmul.f32 %v3550_v23, %v3510_v32  ;;  %v3555_v35 = vmul.f32 %v3553_v24, %v3503_v27  ;;  %v4406_v32 = vld [vmem:[%s5211_s17 + $0x8] sm:$0xff]   ;;  %v4407_v24 = vld [vmem:[%s5211_s17] sm:$0xff]  }
0x1498   :  { %v3554_v30 = vadd.f32 1.0, %v3552_v26  ;;  %v3983_v26 = vld [vmem:[%s5212_s16] ss:$0 sm:$0xff] }
0x149a   :  { %v3556_v37 = vmul.f32 %v3554_v30, %v3504_v29 }
0x149c   :  { %v3566_v38 = vpack.c.bf16 %v3556_v37, %v3555_v35 }
0x149e   :  { %4318 = vmatmul.mubr.msk.bf16.vlgmr.msra.gmra.mxu1 %vm1806_vm7, %v3566_v38 }
0x155e   :  { %v3636_v39 = vpop.f32.mrf.mxu1 }
0x155f   :  { %v3637_v41 = vadd.f32 %v3973_v22, %v3636_v39 }
0x1560   :  { %v4319_v42 = vpop.f32.mrf.mxu1 }
0x1561   :  { %v3643_v46 = vadd.f32 %v3637_v41, %v5122_v33 }
0x1562   :  { %v3639_v28 = vpop.f32.mrf.mxu1 }
0x1563   :  { %v3640_v47 = vadd.f32 %v3973_v22, %v3639_v28  ;;  %v3649_v45 = vsel %vm67_vm0, %v3643_v46, 0.0 }
0x1564   :  { %3650 = vadd.xlane.f32.xlu1 %v3649_v45  ;;  %v4320_v48 = vpop.f32.mrf.mxu1 }
0x1565   :  { %v3644_v49 = vadd.f32 %v3640_v47, %v5124_v34  ;;  %v4404_v34 = vld [vmem:[%s5210_s15 + $0x8] sm:$0xff]  }
0x1566   :  { %4322 = vmatpush3.bf16.msra.mxu0 %v4404_v34 }
0x1567   :  { %v3652_v50 = vsel %vm67_vm0, %v3644_v49, 0.0  ;;  %4323 = vmatprep.subr.bf16.mxu0 %v4510_v14 }
0x1568   :  { %3653 = vadd.xlane.f32.xlu0 %v3652_v50 }
0x156a   :  { %4324 = vmatpush3.bf16.msra.mxu0 %v4405_v59 }
0x156b   :  { %4329 = vmatprep.subr.bf16.mxu0 %v4510_v14 }
0x15ed   :  { %v3651_v51 = vpop.xlane.xlu1 %3650 }
0x15ee   :  { %v3655_v52 = vmul.f32 0.03125, %v3651_v51 }
0x15f0   :  { %v3657_v53 = vsub.f32 %v3643_v46, %v3655_v52 }
0x15f1   :  { %v3654_v54 = vpop.xlane.xlu0 %3653 }
0x15f2   :  { %v3656_v55 = vmul.f32 0.03125, %v3654_v54  ;;  %v3659_v56 = vmul.f32 %v3657_v53, %v3657_v53 }
0x15f4   :  { %v3658_v57 = vsub.f32 %v3644_v49, %v3656_v55  ;;  %v3661_v33 = vsel %vm67_vm0, %v3659_v56, 0.0 }
0x15f5   :  { %3662 = vadd.xlane.f32.xlu1 %v3661_v33 }
0x15f6   :  { %v3660_v58 = vmul.f32 %v3658_v57, %v3658_v57 }
0x15f8   :  { %v3664_v36 = vsel %vm67_vm0, %v3660_v58, 0.0 }
0x15f9   :  { %3665 = vadd.xlane.f32.xlu0 %v3664_v36 }
0x167e   :  { %v3663_v25 = vpop.xlane.xlu1 %3662 }
0x167f   :  { %v3667_v60 = vmul.f32 0.03125, %v3663_v25 }
0x1681   :  { %v3669_v61 = vadd.f32 1e-12, %v3667_v60 }
0x1682   :  { %v3666_v62 = vpop.xlane.xlu0 %3665 }
0x1683   :  { %4504 = vrsqrt.f32 %v3669_v61  ;;  %v3668_v63 = vmul.f32 0.03125, %v3666_v62 }
0x1685   :  { %v3670_v0 = vadd.f32 1e-12, %v3668_v63 }
0x1687   :  { %4506 = vrsqrt.f32 %v3670_v0 }
0x1690   :  { %v4505_v43 = vpop.eup %4504 }
0x1691   :  { %v3673_v2 = vmul.f32 %v4505_v43, %v3657_v53 }
0x1693   :  { %v3681_v4 = vmul.f32 %v3981_v1, %v3673_v2 }
0x1694   :  { %v4507_v44 = vpop.eup %4506 }
0x1695   :  { %v3674_v5 = vmul.f32 %v4507_v44, %v3658_v57  ;;  %v3689_v7 = vadd.f32 %v3982_v3, %v3681_v4 }
0x1697   :  { %v3682_v6 = vmul.f32 %v3981_v1, %v3674_v5  ;;  %v3695_v10 = vrot.slane %v3689_v7, 6  ;;  %v3697_v11 = vrot.slane %v3689_v7, 5  ;;  %v3699_v40 = vrot.slane %v3689_v7, 4 }
0x1698   :  { %v3701_v12 = vrot.slane %v3689_v7, 3  ;;  %v3703_v15 = vrot.slane %v3689_v7, 2  ;;  %v3705_v17 = vrot.slane %v3689_v7, 1 }
0x1699   :  { %v3690_v8 = vadd.f32 %v3982_v3, %v3682_v6 }
0x169b   :  { %v3692_v9 = vrot.slane %v3690_v8, 7 }
0x169d   :  { %v3708_v18 = vsel %vm3707_vm10, %v3689_v7, %v3692_v9 }
0x169e   :  { %v3710_v19 = vsel %vm3709_vm11, %v3708_v18, %v3695_v10 }
0x169f   :  { %v3712_v13 = vsel %vm3711_vm12, %v3710_v19, %v3697_v11 }
0x16a0   :  { %v3714_v16 = vsel %vm3713_vm13, %v3712_v13, %v3699_v40 }
0x16a1   :  { %v3716_v20 = vsel %vm3715_vm14, %v3714_v16, %v3701_v12 }
0x16a2   :  { %v3718_v21 = vsel %vm3717_vm15, %v3716_v20, %v3703_v15 }
0x16a3   :  { %v3720_v31 = vsel %vm3719_vm2, %v3718_v21, %v3705_v17 }
0x16a4   :  { %v3725_v23 = vpack.c.bf16 %v3720_v31, %v3720_v31 }
0x16a6   :  { %4326 = vmatmul.mubr.msk.bf16.vlgmr.msra.gmra.mxu0 %vm67_vm0, %v3725_v23 }
0x16a7   :  { %4333 = vmatprep.mubr.msk.bf16.mxu0 %vm4511_vm1, %v4510_v14  ;;  %4330 = vmatpush3.bf16.msra.mxu0 %v4406_v32 }
0x16a8   :  { %4331 = vmatprep.subr.bf16.mxu0 %v4510_v14  ;;  %v3987_v14 = vld [vmem:[%s5213_s18] ss:$0 sm:$0xff] }
0x16ab   :  { %4332 = vmatpush3.bf16.msra.mxu0 %v4407_v24 }
0x1766   :  { %v3782_v27 = vpop.f32.mrf.mxu0 }
0x1767   :  { %v3783_v29 = vadd.f32 %v3983_v26, %v3782_v27 }
0x1768   :  { %v4327_v30 = vpop.f32.mrf.mxu0 }
0x1769   :  { %4508 = vtanh.f32 %v3783_v29 }
0x176a   :  { %v3785_v35 = vpop.f32.mrf.mxu0 }
0x176c   :  { %v4328_v37 = vpop.f32.mrf.mxu0 }
0x1776   :  { %v4509_v38 = vpop.eup %4508 }
0x1777   :  { %v3793_v22 = vpack.c.bf16 %v4509_v38, %v4509_v38 }
0x1779   :  { %4334 = vmatmul.mubr.msk.bf16.vlgmr.msra.gmra.mxu0 %vm67_vm0, %v3793_v22 }
0x1839   :  { %v3850_v39 = vpop.f32.mrf.mxu0 }
0x183a   :  { %v3851_v41 = vadd.f32 %v3987_v14, %v3850_v39 }
0x183b   :  { %v4335_v42 = vpop.f32.mrf.mxu0 }
0x183c   :  { %3856 = vst [vmem:[%s5214_s19] sm:$0xff] %v3851_v41 }
0x183d   :  { %v3853_v46 = vpop.f32.mrf.mxu0 }
0x183f   :  { %v4336_v28 = vpop.f32.mrf.mxu0 }

</bundles_post_ra>
